<compile_context>
chip_gen: v7x
topology: tpu7x:2x2x1
jax: 0.10.0
libtpu: 0.0.40
codegen_flags: <defaults>
</compile_context>

<pallas_src>
import functools
import math

import jax
import jax.numpy as jnp
from jax.experimental import pallas as pl
from jax.experimental.pallas import tpu as pltpu

LN_EPS = 1e-5  # PyTorch nn.LayerNorm default


def _layernorm(x, w, b):
    mu = jnp.mean(x, axis=-1, keepdims=True)
    var = jnp.mean((x - mu) ** 2, axis=-1, keepdims=True)
    return (x - mu) * jax.lax.rsqrt(var + LN_EPS) * w + b


# ------------------------------ fused kernel --------------------------------

def fused_dit_kernel(patches_ref, conv_w_ref, conv_b_ref, pe_w_ref, pe_b_ref,
                     pos_ref, mod_ref,
                     ln1_w_ref, ln1_b_ref, wqkv_ref, bqkv_ref, wo_ref, bo_ref,
                     ln2_w_ref, ln2_b_ref, ff1_w_ref, ff1_b_ref,
                     ff2_w_ref, ff2_b_ref,
                     lnf_w_ref, lnf_b_ref, out_w_ref, out_b_ref,
                     out_ref, h_ref, *, Bt, N, E, H, dit_num):
    L = pl.program_id(1)          # block index (the "arbitrary"/carried axis)
    M = Bt * N
    HE = H * E
    bf16 = jnp.bfloat16

    # ---- patchify-conv + patch_emb + positional add (first block step) ----
    @pl.when(L == 0)
    def _():
        pt = patches_ref[...].reshape(M, -1).astype(bf16)          # (M, C*ps*ps)
        z = jnp.dot(pt, conv_w_ref[...],
                    preferred_element_type=jnp.float32) + conv_b_ref[...]
        emb = jnp.dot(z.astype(bf16), pe_w_ref[...],
                      preferred_element_type=jnp.float32) + pe_b_ref[...]
        h_ref[...] = emb.reshape(Bt, N, E) + pos_ref[...]

    x3 = h_ref[...]                                   # (Bt, N, E) f32, resident
    mod = mod_ref[...]                                # (Bt, 6, E)
    g1, b1m, a1 = mod[:, 0:1, :], mod[:, 1:2, :], mod[:, 2:3, :]
    g2, b2m, a2 = mod[:, 3:4, :], mod[:, 4:5, :], mod[:, 5:6, :]

    # --- adaLN-modulated multi-head self-attention ---
    y3 = _layernorm(x3, ln1_w_ref[...], ln1_b_ref[...]) * (1.0 + g1) + b1m
    y2 = y3.reshape(M, E).astype(bf16)
    qkv = jnp.dot(y2, wqkv_ref[...],
                  preferred_element_type=jnp.float32) + bqkv_ref[...]  # (M, 3*H*E)

    # reference DiTBlock: attn scale is 1/sqrt(q.size(2)) == 1/sqrt(seq_len)
    scale = 1.0 / math.sqrt(N)

    def heads(base):
        # (M, H*E) columns [base+h*E : base+(h+1)*E]  ->  (Bt*H, N, E), b-major
        parts = [qkv[:, base + h * E: base + (h + 1) * E].reshape(Bt, N, E)
                 for h in range(H)]
        return jnp.stack(parts, axis=1).reshape(Bt * H, N, E)

    qh = (heads(0) * scale).astype(bf16)              # scale folded into q once
    kh = heads(HE).astype(bf16)
    vh = heads(2 * HE).astype(bf16)

    att = jnp.einsum('bqe,bke->bqk', qh, kh,
                     preferred_element_type=jnp.float32)          # (Bt*H, N, N)
    att = att - jnp.max(att, axis=-1, keepdims=True)
    pexp = jnp.exp(att)
    prob = pexp * pl.reciprocal(jnp.sum(pexp, axis=-1, keepdims=True),
                                approx=True)
    oh = jnp.einsum('bqk,bke->bqe', prob.astype(bf16), vh,
                    preferred_element_type=jnp.float32)           # (Bt*H, N, E)

    oh4 = oh.reshape(Bt, H, N, E)
    o = jnp.concatenate([oh4[:, h].reshape(M, E) for h in range(H)],
                        axis=1)                                   # (M, H*E)
    attn = jnp.dot(o.astype(bf16), wo_ref[...],
                   preferred_element_type=jnp.float32) + bo_ref[...]
    y3 = x3 + attn.reshape(Bt, N, E) * a1

    # --- adaLN-modulated MLP ---
    z3 = _layernorm(y3, ln2_w_ref[...], ln2_b_ref[...]) * (1.0 + g2) + b2m
    z2 = z3.reshape(M, E).astype(bf16)
    hdn = jnp.dot(z2, ff1_w_ref[...],
                  preferred_element_type=jnp.float32) + ff1_b_ref[...]
    hdn = jnp.maximum(hdn, 0.0).astype(bf16)
    ff = jnp.dot(hdn, ff2_w_ref[...],
                 preferred_element_type=jnp.float32) + ff2_b_ref[...]
    h3 = y3 + ff.reshape(Bt, N, E) * a2
    h_ref[...] = h3                                    # carry to next block

    # ---- final LayerNorm + linear (last block step only) ----
    @pl.when(L == dit_num - 1)
    def _():
        tkn = _layernorm(h3, lnf_w_ref[...], lnf_b_ref[...]).reshape(M, E)
        out = jnp.dot(tkn.astype(bf16), out_w_ref[...],
                      preferred_element_type=jnp.float32) + out_b_ref[...]
        out_ref[...] = out.reshape(Bt, N, -1)


# --------------------------- pallas_call wrapper -----------------------------

def _pick_batch_tile(B, N):
    """Largest divisor of B with Bt*N <= 1024, preferring Bt*N >= 256."""
    best = 1
    for d in range(1, B + 1):
        if B % d == 0 and d * N <= 1024:
            best = d
            if d * N >= 256:
                break
    return best


def fused_dit_call(xp, mod, params, *, Bt, N, E, H, dit_num, cp_pad):
    B, _, cp = xp.shape
    HE = H * E

    kern = functools.partial(fused_dit_kernel, Bt=Bt, N=N, E=E, H=H,
                             dit_num=dit_num)

    def _const(shape):
        nd = len(shape)
        return pl.BlockSpec(shape, lambda bt, l, nd=nd: (0,) * nd)

    def _blk(shape):
        rest = tuple(shape[1:])
        return pl.BlockSpec((None,) + rest,
                            lambda bt, l, n=len(rest): (l,) + (0,) * n)

    arrays = [xp,
              params["conv_w"], params["conv_b"],
              params["pe_w"], params["pe_b"], params["pos"],
              mod,
              params["ln1_w"], params["ln1_b"],
              params["wqkv"], params["bqkv"],
              params["wo"], params["bo"],
              params["ln2_w"], params["ln2_b"],
              params["ff1_w"], params["ff1_b"],
              params["ff2_w"], params["ff2_b"],
              params["lnf_w"], params["lnf_b"],
              params["out_w"], params["out_b"]]

    in_specs = [
        pl.BlockSpec((Bt, N, cp), lambda bt, l: (bt, 0, 0)),           # patches
        _const(params["conv_w"].shape), _const(params["conv_b"].shape),
        _const(params["pe_w"].shape), _const(params["pe_b"].shape),
        _const(params["pos"].shape),
        pl.BlockSpec((Bt, None, 6, E), lambda bt, l: (bt, l, 0, 0)),   # mod
        _blk(params["ln1_w"].shape), _blk(params["ln1_b"].shape),
        _blk(params["wqkv"].shape), _blk(params["bqkv"].shape),
        _blk(params["wo"].shape), _blk(params["bo"].shape),
        _blk(params["ln2_w"].shape), _blk(params["ln2_b"].shape),
        _blk(params["ff1_w"].shape), _blk(params["ff1_b"].shape),
        _blk(params["ff2_w"].shape), _blk(params["ff2_b"].shape),
        _const(params["lnf_w"].shape), _const(params["lnf_b"].shape),
        _const(params["out_w"].shape), _const(params["out_b"].shape),
    ]
    out_spec = pl.BlockSpec((Bt, N, cp_pad), lambda bt, l: (bt, 0, 0))

    flops_per_img = (2 * N * cp * cp + 2 * N * cp * E
                     + dit_num * (2 * N * E * 3 * HE + 4 * H * N * N * E
                                  + 2 * N * HE * E + 16 * N * E * E)
                     + 2 * N * E * cp_pad)
    cost = pl.CostEstimate(
        flops=B * flops_per_img,
        transcendentals=B * dit_num * H * N * N,
        bytes_accessed=(sum(int(a.size) * a.dtype.itemsize for a in arrays)
                        + B * N * cp_pad * 4))

    return pl.pallas_call(
        kern,
        out_shape=jax.ShapeDtypeStruct((B, N, cp_pad), jnp.float32),
        grid=(B // Bt, dit_num),
        in_specs=in_specs,
        out_specs=out_spec,
        scratch_shapes=[pltpu.VMEM((Bt, N, E), jnp.float32)],
        compiler_params=pltpu.CompilerParams(
            dimension_semantics=("parallel", "arbitrary")),
        cost_estimate=cost,
    )(*arrays)


# --------------------------- parameters & forward ----------------------------

def init_params(key, *, img_size, patch_size, channel, emb_size, label_num,
                dit_num, head):
    pc = img_size // patch_size
    N = pc * pc
    cp = channel * patch_size ** 2
    cp_pad = ((cp + 127) // 128) * 128
    E = emb_size
    HE = head * E
    bf16 = jnp.bfloat16
    keys = iter(jax.random.split(key, 64))

    def w(shape, scale=0.02, dtype=jnp.float32):
        return (jax.random.normal(next(keys), shape, jnp.float32) * scale
                ).astype(dtype)

    params = {
        # All matmul weights pre-transposed to (in_features, out_features), bf16.
        "conv_w": w((cp, cp), dtype=bf16),        # flattened patch-conv kernel
        "conv_b": w((1, cp), 0.01),
        "pe_w": w((cp, E), dtype=bf16),
        "pe_b": w((1, E), 0.01),
        "pos": jax.random.uniform(next(keys), (N, E), jnp.float32),
        "t1_w": w((E, E)),
        "t1_b": w((1, E), 0.01),
        "t2_w": w((E, E)),
        "t2_b": w((1, E), 0.01),
        "label_emb": w((label_num, E), 1.0),
        # all adaLN modulation linears fused: (E, dit_num*6*E)
        "mod_w": w((E, dit_num * 6 * E)),
        "mod_b": w((1, dit_num * 6 * E), 0.01),
        "lnf_w": jnp.ones((1, E), jnp.float32),
        "lnf_b": jnp.zeros((1, E), jnp.float32),
        # final linear, zero-padded to a lane-dense (multiple of 128) width
        "out_w": jnp.zeros((E, cp_pad), bf16).at[:, :cp].set(
            w((E, cp), dtype=bf16)),
        "out_b": jnp.zeros((1, cp_pad), jnp.float32).at[:, :cp].set(
            w((1, cp), 0.01)),
        # per-block weights stacked along a leading dit_num axis
        "ln1_w": jnp.ones((dit_num, 1, E), jnp.float32),
        "ln1_b": jnp.zeros((dit_num, 1, E), jnp.float32),
        "ln2_w": jnp.ones((dit_num, 1, E), jnp.float32),
        "ln2_b": jnp.zeros((dit_num, 1, E), jnp.float32),
        "wqkv": w((dit_num, E, 3 * HE), dtype=bf16),   # [q | k | v], head-major
        "bqkv": w((dit_num, 1, 3 * HE), 0.01),
        "wo": w((dit_num, HE, E), dtype=bf16),
        "bo": w((dit_num, 1, E), 0.01),
        "ff1_w": w((dit_num, E, 4 * E), dtype=bf16),
        "ff1_b": w((dit_num, 1, 4 * E), 0.01),
        "ff2_w": w((dit_num, 4 * E, E), dtype=bf16),
        "ff2_b": w((dit_num, 1, E), 0.01),
    }
    return params


def dit_forward(params, x, t, y, *, patch_size, emb_size, head):
    B, C, Himg, Wimg = x.shape
    ps = patch_size
    pc = Himg // ps
    N = pc * pc
    E = emb_size
    cp = C * ps * ps
    dit_num = params["wqkv"].shape[0]
    cp_pad = params["out_w"].shape[1]

    # ---- conditioning (tiny per-image vectors; plain-JAX glue) ----
    half = E // 2
    freqs = jnp.exp(jnp.arange(half, dtype=jnp.float32)
                    * (-math.log(10000.0) / (half - 1)))
    ang = t.astype(jnp.float32)[:, None] * freqs[None, :]
    temb = jnp.concatenate([jnp.sin(ang), jnp.cos(ang)], axis=-1)   # (B, E)
    temb = jnp.maximum(temb @ params["t1_w"] + params["t1_b"], 0.0)
    temb = temb @ params["t2_w"] + params["t2_b"]
    cond = params["label_emb"][y] + temb                            # (B, E)

    # all 6*dit_num adaLN modulation vectors in one GEMM
    mod = (cond @ params["mod_w"] + params["mod_b"]).reshape(B, dit_num, 6, E)

    # ---- patchify: NCHW -> (B, N, C*ps*ps); strided conv becomes a matmul ----
    xp = x.reshape(B, C, pc, ps, pc, ps).transpose(0, 2, 4, 1, 3, 5)
    xp = xp.reshape(B, N, cp)

    Bt = _pick_batch_tile(B, N)
    tokens_p = fused_dit_call(xp, mod, params, Bt=Bt, N=N, E=E, H=head,
                              dit_num=dit_num, cp_pad=cp_pad)       # (B,N,cp_pad)
    tokens = tokens_p[..., :cp]

    # ---- unpatchify: mirrors the torch view/permute chain exactly ----
    o = tokens.reshape(B, pc, pc, C, ps, ps)
    o = o.transpose(0, 3, 1, 2, 4, 5)
    o = o.transpose(0, 1, 2, 4, 3, 5)
    return o.reshape(B, C, pc * ps, pc * ps)


# ------------------------------------ main ------------------------------------

if __name__ == "__main__":
    img_size, patch_size, channel = 16, 4, 4
    emb_size, label_num, dit_num, head = 32, 10, 2, 2
    B = 2

    kp, kx, kt, ky = jax.random.split(jax.random.PRNGKey(0), 4)
    params = init_params(kp, img_size=img_size, patch_size=patch_size,
                         channel=channel, emb_size=emb_size,
                         label_num=label_num, dit_num=dit_num, head=head)

    x = jax.random.normal(kx, (B, channel, img_size, img_size), jnp.float32)
    t = jax.random.randint(kt, (B,), 0, 1000).astype(jnp.float32)
    y = jax.random.randint(ky, (B,), 0, label_num)

    fwd = jax.jit(functools.partial(dit_forward, patch_size=patch_size,
                                    emb_size=emb_size, head=head))
    out = fwd(params, x, t, y)
    jax.block_until_ready(out)
    assert out.shape == (B, channel, img_size, img_size), out.shape
    print("KERNEL_OK")
</pallas_src>

<mosaic_0001>
module attributes {stable_mosaic.version = 11 : i64} {
  func.func @fused_dit_kernel(%arg0: i32, %arg1: i32, %arg2: memref<2x16x64xf32, #tpu.memory_space<vmem>>, %arg3: memref<64x64xbf16, #tpu.memory_space<vmem>>, %arg4: memref<1x64xf32, #tpu.memory_space<vmem>>, %arg5: memref<64x32xbf16, #tpu.memory_space<vmem>>, %arg6: memref<1x32xf32, #tpu.memory_space<vmem>>, %arg7: memref<16x32xf32, #tpu.memory_space<vmem>>, %arg8: memref<2x1x6x32xf32, #tpu.memory_space<vmem>>, %arg9: memref<1x1x32xf32, #tpu.memory_space<vmem>>, %arg10: memref<1x1x32xf32, #tpu.memory_space<vmem>>, %arg11: memref<1x32x192xbf16, #tpu.memory_space<vmem>>, %arg12: memref<1x1x192xf32, #tpu.memory_space<vmem>>, %arg13: memref<1x64x32xbf16, #tpu.memory_space<vmem>>, %arg14: memref<1x1x32xf32, #tpu.memory_space<vmem>>, %arg15: memref<1x1x32xf32, #tpu.memory_space<vmem>>, %arg16: memref<1x1x32xf32, #tpu.memory_space<vmem>>, %arg17: memref<1x32x128xbf16, #tpu.memory_space<vmem>>, %arg18: memref<1x1x128xf32, #tpu.memory_space<vmem>>, %arg19: memref<1x128x32xbf16, #tpu.memory_space<vmem>>, %arg20: memref<1x1x32xf32, #tpu.memory_space<vmem>>, %arg21: memref<1x32xf32, #tpu.memory_space<vmem>>, %arg22: memref<1x32xf32, #tpu.memory_space<vmem>>, %arg23: memref<32x128xbf16, #tpu.memory_space<vmem>>, %arg24: memref<1x128xf32, #tpu.memory_space<vmem>>, %arg25: memref<2x16x128xf32, #tpu.memory_space<vmem>>, %arg26: memref<2x16x32xf32, #tpu.memory_space<vmem>>) attributes {dimension_semantics = [#tpu.dimension_semantics<parallel>, #tpu.dimension_semantics<arbitrary>], iteration_bounds = array<i64: 1, 2>, scalar_prefetch = 0 : i64, scratch_operands = 1 : i64, tpu.core_type = #tpu.core_type<tc>, window_params = [{transform_indices = @transform_0, window_bounds = array<i64: 2, 16, 64>}, {pipeline_mode = #tpu.pipeline_mode<synchronous>, transform_indices = @transform_1, window_bounds = array<i64: 64, 64>}, {pipeline_mode = #tpu.pipeline_mode<synchronous>, transform_indices = @transform_2, window_bounds = array<i64: 1, 64>}, {pipeline_mode = #tpu.pipeline_mode<synchronous>, transform_indices = @transform_3, window_bounds = array<i64: 64, 32>}, {pipeline_mode = #tpu.pipeline_mode<synchronous>, transform_indices = @transform_4, window_bounds = array<i64: 1, 32>}, {pipeline_mode = #tpu.pipeline_mode<synchronous>, transform_indices = @transform_5, window_bounds = array<i64: 16, 32>}, {transform_indices = @transform_6, window_bounds = array<i64: 2, 1, 6, 32>}, {transform_indices = @transform_7, window_bounds = array<i64: 1, 1, 32>}, {transform_indices = @transform_8, window_bounds = array<i64: 1, 1, 32>}, {transform_indices = @transform_9, window_bounds = array<i64: 1, 32, 192>}, {transform_indices = @transform_10, window_bounds = array<i64: 1, 1, 192>}, {transform_indices = @transform_11, window_bounds = array<i64: 1, 64, 32>}, {transform_indices = @transform_12, window_bounds = array<i64: 1, 1, 32>}, {transform_indices = @transform_13, window_bounds = array<i64: 1, 1, 32>}, {transform_indices = @transform_14, window_bounds = array<i64: 1, 1, 32>}, {transform_indices = @transform_15, window_bounds = array<i64: 1, 32, 128>}, {transform_indices = @transform_16, window_bounds = array<i64: 1, 1, 128>}, {transform_indices = @transform_17, window_bounds = array<i64: 1, 128, 32>}, {transform_indices = @transform_18, window_bounds = array<i64: 1, 1, 32>}, {pipeline_mode = #tpu.pipeline_mode<synchronous>, transform_indices = @transform_19, window_bounds = array<i64: 1, 32>}, {pipeline_mode = #tpu.pipeline_mode<synchronous>, transform_indices = @transform_20, window_bounds = array<i64: 1, 32>}, {pipeline_mode = #tpu.pipeline_mode<synchronous>, transform_indices = @transform_21, window_bounds = array<i64: 32, 128>}, {pipeline_mode = #tpu.pipeline_mode<synchronous>, transform_indices = @transform_22, window_bounds = array<i64: 1, 128>}, {transform_indices = @transform_23, window_bounds = array<i64: 2, 16, 128>}]} {
    %c0_i32 = arith.constant 0 : i32
    %0 = arith.cmpi eq, %arg1, %c0_i32 : i32
    %1 = arith.extui %0 : i1 to i32
    %c0_i32_0 = arith.constant 0 : i32
    %2 = arith.cmpi ne, %1, %c0_i32_0 : i32
    scf.if %2 {
      %c0_68 = arith.constant 0 : index
      %c0_69 = arith.constant 0 : index
      %c0_70 = arith.constant 0 : index
      %178 = vector.load %arg2[%c0_68, %c0_69, %c0_70] : memref<2x16x64xf32, #tpu.memory_space<vmem>>, vector<2x16x64xf32>
      %179 = vector.shape_cast %178 : vector<2x16x64xf32> to vector<32x64xf32>
      %180 = arith.truncf %179 : vector<32x64xf32> to vector<32x64xbf16>
      %c0_71 = arith.constant 0 : index
      %c0_72 = arith.constant 0 : index
      %181 = vector.load %arg3[%c0_71, %c0_72] : memref<64x64xbf16, #tpu.memory_space<vmem>>, vector<64x64xbf16>
      %cst_73 = arith.constant dense<0.000000e+00> : vector<32x64xf32>
      %182 = tpu.matmul %180, %181, %cst_73 {dimension_numbers = #tpu.dot_dimension_numbers<[1], [0], [0], [1], [0, 0, 1, 1], [], []>} : vector<32x64xbf16>, vector<64x64xbf16>, vector<32x64xf32> -> vector<32x64xf32>
      %c0_74 = arith.constant 0 : index
      %c0_75 = arith.constant 0 : index
      %183 = vector.load %arg4[%c0_74, %c0_75] : memref<1x64xf32, #tpu.memory_space<vmem>>, vector<1x64xf32>
      %184 = vector.broadcast %183 : vector<1x64xf32> to vector<32x64xf32>
      %185 = arith.addf %182, %184 : vector<32x64xf32>
      %186 = arith.truncf %185 : vector<32x64xf32> to vector<32x64xbf16>
      %c0_76 = arith.constant 0 : index
      %c0_77 = arith.constant 0 : index
      %187 = vector.load %arg5[%c0_76, %c0_77] : memref<64x32xbf16, #tpu.memory_space<vmem>>, vector<64x32xbf16>
      %cst_78 = arith.constant dense<0.000000e+00> : vector<32x32xf32>
      %188 = tpu.matmul %186, %187, %cst_78 {dimension_numbers = #tpu.dot_dimension_numbers<[1], [0], [0], [1], [0, 0, 1, 1], [], []>} : vector<32x64xbf16>, vector<64x32xbf16>, vector<32x32xf32> -> vector<32x32xf32>
      %c0_79 = arith.constant 0 : index
      %c0_80 = arith.constant 0 : index
      %189 = vector.load %arg6[%c0_79, %c0_80] : memref<1x32xf32, #tpu.memory_space<vmem>>, vector<1x32xf32>
      %190 = vector.broadcast %189 : vector<1x32xf32> to vector<32x32xf32>
      %191 = arith.addf %188, %190 : vector<32x32xf32>
      %192 = vector.shape_cast %191 : vector<32x32xf32> to vector<2x16x32xf32>
      %c0_81 = arith.constant 0 : index
      %c0_82 = arith.constant 0 : index
      %193 = vector.load %arg7[%c0_81, %c0_82] : memref<16x32xf32, #tpu.memory_space<vmem>>, vector<16x32xf32>
      %194 = vector.shape_cast %193 : vector<16x32xf32> to vector<1x16x32xf32>
      %195 = vector.broadcast %194 : vector<1x16x32xf32> to vector<2x16x32xf32>
      %196 = arith.addf %192, %195 : vector<2x16x32xf32>
      %c0_83 = arith.constant 0 : index
      %c0_84 = arith.constant 0 : index
      %c0_85 = arith.constant 0 : index
      %197 = vector.load %arg26[%c0_83, %c0_84, %c0_85] : memref<2x16x32xf32, #tpu.memory_space<vmem>>, vector<2x16x32xf32>
      tpu.vector_store %arg26[%c0_83, %c0_84, %c0_85], %196 {strides = array<i32>} : memref<2x16x32xf32, #tpu.memory_space<vmem>>, vector<2x16x32xf32>,
    } else {
    }
    %c0 = arith.constant 0 : index
    %c0_1 = arith.constant 0 : index
    %c0_2 = arith.constant 0 : index
    %3 = vector.load %arg26[%c0, %c0_1, %c0_2] : memref<2x16x32xf32, #tpu.memory_space<vmem>>, vector<2x16x32xf32>
    %c0_3 = arith.constant 0 : index
    %c0_4 = arith.constant 0 : index
    %c0_5 = arith.constant 0 : index
    %c0_6 = arith.constant 0 : index
    %4 = vector.load %arg8[%c0_3, %c0_4, %c0_5, %c0_6] : memref<2x1x6x32xf32, #tpu.memory_space<vmem>>, vector<2x1x6x32xf32>
    %5 = vector.shape_cast %4 : vector<2x1x6x32xf32> to vector<2x6x32xf32>
    %6 = vector.extract_strided_slice %5 {offsets = [0, 0, 0], sizes = [2, 1, 32], strides = [1, 1, 1]} : vector<2x6x32xf32> to vector<2x1x32xf32>
    %7 = vector.extract_strided_slice %5 {offsets = [0, 1, 0], sizes = [2, 1, 32], strides = [1, 1, 1]} : vector<2x6x32xf32> to vector<2x1x32xf32>
    %8 = vector.extract_strided_slice %5 {offsets = [0, 2, 0], sizes = [2, 1, 32], strides = [1, 1, 1]} : vector<2x6x32xf32> to vector<2x1x32xf32>
    %9 = vector.extract_strided_slice %5 {offsets = [0, 3, 0], sizes = [2, 1, 32], strides = [1, 1, 1]} : vector<2x6x32xf32> to vector<2x1x32xf32>
    %10 = vector.extract_strided_slice %5 {offsets = [0, 4, 0], sizes = [2, 1, 32], strides = [1, 1, 1]} : vector<2x6x32xf32> to vector<2x1x32xf32>
    %11 = vector.extract_strided_slice %5 {offsets = [0, 5, 0], sizes = [2, 1, 32], strides = [1, 1, 1]} : vector<2x6x32xf32> to vector<2x1x32xf32>
    %c0_7 = arith.constant 0 : index
    %c0_8 = arith.constant 0 : index
    %c0_9 = arith.constant 0 : index
    %12 = vector.load %arg9[%c0_7, %c0_8, %c0_9] : memref<1x1x32xf32, #tpu.memory_space<vmem>>, vector<1x1x32xf32>
    %13 = vector.shape_cast %12 : vector<1x1x32xf32> to vector<1x32xf32>
    %c0_10 = arith.constant 0 : index
    %c0_11 = arith.constant 0 : index
    %c0_12 = arith.constant 0 : index
    %14 = vector.load %arg10[%c0_10, %c0_11, %c0_12] : memref<1x1x32xf32, #tpu.memory_space<vmem>>, vector<1x1x32xf32>
    %15 = vector.shape_cast %14 : vector<1x1x32xf32> to vector<1x32xf32>
    %cst = arith.constant dense<0.000000e+00> : vector<2x16xf32>
    %16 = vector.multi_reduction <add>, %3, %cst [2] : vector<2x16x32xf32> to vector<2x16xf32>
    %17 = vector.shape_cast %16 : vector<2x16xf32> to vector<2x16x1xf32>
    %cst_13 = arith.constant 3.200000e+01 : f32
    %18 = vector.broadcast %cst_13 : f32 to vector<2x16x1xf32>
    %19 = arith.divf %17, %18 : vector<2x16x1xf32>
    %20 = vector.broadcast %19 : vector<2x16x1xf32> to vector<2x16x32xf32>
    %21 = arith.subf %3, %20 : vector<2x16x32xf32>
    %22 = arith.mulf %21, %21 : vector<2x16x32xf32>
    %cst_14 = arith.constant dense<0.000000e+00> : vector<2x16xf32>
    %23 = vector.multi_reduction <add>, %22, %cst_14 [2] : vector<2x16x32xf32> to vector<2x16xf32>
    %24 = vector.shape_cast %23 : vector<2x16xf32> to vector<2x16x1xf32>
    %cst_15 = arith.constant 3.200000e+01 : f32
    %25 = vector.broadcast %cst_15 : f32 to vector<2x16x1xf32>
    %26 = arith.divf %24, %25 : vector<2x16x1xf32>
    %27 = vector.broadcast %19 : vector<2x16x1xf32> to vector<2x16x32xf32>
    %28 = arith.subf %3, %27 : vector<2x16x32xf32>
    %cst_16 = arith.constant 9.99999974E-6 : f32
    %29 = vector.broadcast %cst_16 : f32 to vector<2x16x1xf32>
    %30 = arith.addf %26, %29 : vector<2x16x1xf32>
    %31 = math.rsqrt %30 : vector<2x16x1xf32>
    %32 = vector.broadcast %31 : vector<2x16x1xf32> to vector<2x16x32xf32>
    %33 = arith.mulf %28, %32 : vector<2x16x32xf32>
    %34 = vector.shape_cast %13 : vector<1x32xf32> to vector<1x1x32xf32>
    %35 = vector.broadcast %34 : vector<1x1x32xf32> to vector<2x16x32xf32>
    %36 = arith.mulf %33, %35 : vector<2x16x32xf32>
    %37 = vector.shape_cast %15 : vector<1x32xf32> to vector<1x1x32xf32>
    %38 = vector.broadcast %37 : vector<1x1x32xf32> to vector<2x16x32xf32>
    %39 = arith.addf %36, %38 : vector<2x16x32xf32>
    %cst_17 = arith.constant 1.000000e+00 : f32
    %40 = vector.broadcast %cst_17 : f32 to vector<2x1x32xf32>
    %41 = arith.addf %40, %6 : vector<2x1x32xf32>
    %42 = vector.broadcast %41 : vector<2x1x32xf32> to vector<2x16x32xf32>
    %43 = arith.mulf %39, %42 : vector<2x16x32xf32>
    %44 = vector.broadcast %7 : vector<2x1x32xf32> to vector<2x16x32xf32>
    %45 = arith.addf %43, %44 : vector<2x16x32xf32>
    %46 = vector.shape_cast %45 : vector<2x16x32xf32> to vector<32x32xf32>
    %47 = arith.truncf %46 : vector<32x32xf32> to vector<32x32xbf16>
    %c0_18 = arith.constant 0 : index
    %c0_19 = arith.constant 0 : index
    %c0_20 = arith.constant 0 : index
    %48 = vector.load %arg11[%c0_18, %c0_19, %c0_20] : memref<1x32x192xbf16, #tpu.memory_space<vmem>>, vector<1x32x192xbf16>
    %49 = vector.shape_cast %48 : vector<1x32x192xbf16> to vector<32x192xbf16>
    %cst_21 = arith.constant dense<0.000000e+00> : vector<32x192xf32>
    %50 = tpu.matmul %47, %49, %cst_21 {dimension_numbers = #tpu.dot_dimension_numbers<[1], [0], [0], [1], [0, 0, 1, 1], [], []>} : vector<32x32xbf16>, vector<32x192xbf16>, vector<32x192xf32> -> vector<32x192xf32>
    %c0_22 = arith.constant 0 : index
    %c0_23 = arith.constant 0 : index
    %c0_24 = arith.constant 0 : index
    %51 = vector.load %arg12[%c0_22, %c0_23, %c0_24] : memref<1x1x192xf32, #tpu.memory_space<vmem>>, vector<1x1x192xf32>
    %52 = vector.shape_cast %51 : vector<1x1x192xf32> to vector<1x192xf32>
    %53 = vector.broadcast %52 : vector<1x192xf32> to vector<32x192xf32>
    %54 = arith.addf %50, %53 : vector<32x192xf32>
    %55 = vector.extract_strided_slice %54 {offsets = [0, 0], sizes = [32, 32], strides = [1, 1]} : vector<32x192xf32> to vector<32x32xf32>
    %56 = vector.shape_cast %55 : vector<32x32xf32> to vector<2x16x32xf32>
    %57 = vector.extract_strided_slice %54 {offsets = [0, 32], sizes = [32, 32], strides = [1, 1]} : vector<32x192xf32> to vector<32x32xf32>
    %58 = vector.shape_cast %57 : vector<32x32xf32> to vector<2x16x32xf32>
    %59 = vector.shape_cast %56 : vector<2x16x32xf32> to vector<2x1x16x32xf32>
    %60 = vector.shape_cast %58 : vector<2x16x32xf32> to vector<2x1x16x32xf32>
    %61 = tpu.concatenate %59, %60 in 1 : vector<2x1x16x32xf32>, vector<2x1x16x32xf32> -> vector<2x2x16x32xf32>
    %62 = vector.shape_cast %61 : vector<2x2x16x32xf32> to vector<4x16x32xf32>
    %cst_25 = arith.constant 2.500000e-01 : f32
    %63 = vector.broadcast %cst_25 : f32 to vector<4x16x32xf32>
    %64 = arith.mulf %62, %63 : vector<4x16x32xf32>
    %65 = arith.truncf %64 : vector<4x16x32xf32> to vector<4x16x32xbf16>
    %66 = vector.extract_strided_slice %54 {offsets = [0, 64], sizes = [32, 32], strides = [1, 1]} : vector<32x192xf32> to vector<32x32xf32>
    %67 = vector.shape_cast %66 : vector<32x32xf32> to vector<2x16x32xf32>
    %68 = vector.extract_strided_slice %54 {offsets = [0, 96], sizes = [32, 32], strides = [1, 1]} : vector<32x192xf32> to vector<32x32xf32>
    %69 = vector.shape_cast %68 : vector<32x32xf32> to vector<2x16x32xf32>
    %70 = vector.shape_cast %67 : vector<2x16x32xf32> to vector<2x1x16x32xf32>
    %71 = vector.shape_cast %69 : vector<2x16x32xf32> to vector<2x1x16x32xf32>
    %72 = tpu.concatenate %70, %71 in 1 : vector<2x1x16x32xf32>, vector<2x1x16x32xf32> -> vector<2x2x16x32xf32>
    %73 = vector.shape_cast %72 : vector<2x2x16x32xf32> to vector<4x16x32xf32>
    %74 = arith.truncf %73 : vector<4x16x32xf32> to vector<4x16x32xbf16>
    %75 = vector.extract_strided_slice %54 {offsets = [0, 128], sizes = [32, 32], strides = [1, 1]} : vector<32x192xf32> to vector<32x32xf32>
    %76 = vector.shape_cast %75 : vector<32x32xf32> to vector<2x16x32xf32>
    %77 = vector.extract_strided_slice %54 {offsets = [0, 160], sizes = [32, 32], strides = [1, 1]} : vector<32x192xf32> to vector<32x32xf32>
    %78 = vector.shape_cast %77 : vector<32x32xf32> to vector<2x16x32xf32>
    %79 = vector.shape_cast %76 : vector<2x16x32xf32> to vector<2x1x16x32xf32>
    %80 = vector.shape_cast %78 : vector<2x16x32xf32> to vector<2x1x16x32xf32>
    %81 = tpu.concatenate %79, %80 in 1 : vector<2x1x16x32xf32>, vector<2x1x16x32xf32> -> vector<2x2x16x32xf32>
    %82 = vector.shape_cast %81 : vector<2x2x16x32xf32> to vector<4x16x32xf32>
    %83 = arith.truncf %82 : vector<4x16x32xf32> to vector<4x16x32xbf16>
    "tpu.trace_start"() <{level = 10 : i32, message = "bqe,bke->bqk"}> : () -> ()
    %cst_26 = arith.constant dense<0.000000e+00> : vector<4x16x16xf32>
    %84 = tpu.matmul %65, %74, %cst_26 {dimension_numbers = #tpu.dot_dimension_numbers<[2], [2], [1], [1], [0, 0, 0, 1, 1, 1], [0], [0]>} : vector<4x16x32xbf16>, vector<4x16x32xbf16>, vector<4x16x16xf32> -> vector<4x16x16xf32>
    "tpu.trace_stop"() : () -> ()
    %cst_27 = arith.constant dense<0xFF800000> : vector<4x16xf32>
    %85 = vector.multi_reduction <maximumf>, %84, %cst_27 [2] : vector<4x16x16xf32> to vector<4x16xf32>
    %86 = vector.shape_cast %85 : vector<4x16xf32> to vector<4x16x1xf32>
    %87 = vector.broadcast %86 : vector<4x16x1xf32> to vector<4x16x16xf32>
    %88 = arith.subf %84, %87 : vector<4x16x16xf32>
    %89 = math.exp %88 : vector<4x16x16xf32>
    %cst_28 = arith.constant dense<0.000000e+00> : vector<4x16xf32>
    %90 = vector.multi_reduction <add>, %89, %cst_28 [2] : vector<4x16x16xf32> to vector<4x16xf32>
    %91 = vector.shape_cast %90 : vector<4x16xf32> to vector<4x16x1xf32>
    %92 = tpu.reciprocal %91 {approx = true} : vector<4x16x1xf32> -> vector<4x16x1xf32>
    %93 = vector.broadcast %92 : vector<4x16x1xf32> to vector<4x16x16xf32>
    %94 = arith.mulf %89, %93 : vector<4x16x16xf32>
    %95 = arith.truncf %94 : vector<4x16x16xf32> to vector<4x16x16xbf16>
    "tpu.trace_start"() <{level = 10 : i32, message = "bqk,bke->bqe"}> : () -> ()
    %cst_29 = arith.constant dense<0.000000e+00> : vector<4x16x32xf32>
    %96 = tpu.matmul %95, %83, %cst_29 {dimension_numbers = #tpu.dot_dimension_numbers<[2], [1], [1], [2], [0, 0, 0, 1, 1, 2], [0], [0]>} : vector<4x16x16xbf16>, vector<4x16x32xbf16>, vector<4x16x32xf32> -> vector<4x16x32xf32>
    "tpu.trace_stop"() : () -> ()
    %97 = vector.shape_cast %96 : vector<4x16x32xf32> to vector<2x2x16x32xf32>
    %98 = vector.extract_strided_slice %97 {offsets = [0, 0, 0, 0], sizes = [2, 1, 16, 32], strides = [1, 1, 1, 1]} : vector<2x2x16x32xf32> to vector<2x1x16x32xf32>
    %99 = vector.shape_cast %98 : vector<2x1x16x32xf32> to vector<2x16x32xf32>
    %100 = vector.shape_cast %99 : vector<2x16x32xf32> to vector<32x32xf32>
    %101 = vector.extract_strided_slice %97 {offsets = [0, 1, 0, 0], sizes = [2, 1, 16, 32], strides = [1, 1, 1, 1]} : vector<2x2x16x32xf32> to vector<2x1x16x32xf32>
    %102 = vector.shape_cast %101 : vector<2x1x16x32xf32> to vector<2x16x32xf32>
    %103 = vector.shape_cast %102 : vector<2x16x32xf32> to vector<32x32xf32>
    %104 = tpu.concatenate %100, %103 in 1 : vector<32x32xf32>, vector<32x32xf32> -> vector<32x64xf32>
    %105 = arith.truncf %104 : vector<32x64xf32> to vector<32x64xbf16>
    %c0_30 = arith.constant 0 : index
    %c0_31 = arith.constant 0 : index
    %c0_32 = arith.constant 0 : index
    %106 = vector.load %arg13[%c0_30, %c0_31, %c0_32] : memref<1x64x32xbf16, #tpu.memory_space<vmem>>, vector<1x64x32xbf16>
    %107 = vector.shape_cast %106 : vector<1x64x32xbf16> to vector<64x32xbf16>
    %cst_33 = arith.constant dense<0.000000e+00> : vector<32x32xf32>
    %108 = tpu.matmul %105, %107, %cst_33 {dimension_numbers = #tpu.dot_dimension_numbers<[1], [0], [0], [1], [0, 0, 1, 1], [], []>} : vector<32x64xbf16>, vector<64x32xbf16>, vector<32x32xf32> -> vector<32x32xf32>
    %c0_34 = arith.constant 0 : index
    %c0_35 = arith.constant 0 : index
    %c0_36 = arith.constant 0 : index
    %109 = vector.load %arg14[%c0_34, %c0_35, %c0_36] : memref<1x1x32xf32, #tpu.memory_space<vmem>>, vector<1x1x32xf32>
    %110 = vector.shape_cast %109 : vector<1x1x32xf32> to vector<1x32xf32>
    %111 = vector.broadcast %110 : vector<1x32xf32> to vector<32x32xf32>
    %112 = arith.addf %108, %111 : vector<32x32xf32>
    %113 = vector.shape_cast %112 : vector<32x32xf32> to vector<2x16x32xf32>
    %114 = vector.broadcast %8 : vector<2x1x32xf32> to vector<2x16x32xf32>
    %115 = arith.mulf %113, %114 : vector<2x16x32xf32>
    %116 = arith.addf %3, %115 : vector<2x16x32xf32>
    %c0_37 = arith.constant 0 : index
    %c0_38 = arith.constant 0 : index
    %c0_39 = arith.constant 0 : index
    %117 = vector.load %arg15[%c0_37, %c0_38, %c0_39] : memref<1x1x32xf32, #tpu.memory_space<vmem>>, vector<1x1x32xf32>
    %118 = vector.shape_cast %117 : vector<1x1x32xf32> to vector<1x32xf32>
    %c0_40 = arith.constant 0 : index
    %c0_41 = arith.constant 0 : index
    %c0_42 = arith.constant 0 : index
    %119 = vector.load %arg16[%c0_40, %c0_41, %c0_42] : memref<1x1x32xf32, #tpu.memory_space<vmem>>, vector<1x1x32xf32>
    %120 = vector.shape_cast %119 : vector<1x1x32xf32> to vector<1x32xf32>
    %cst_43 = arith.constant dense<0.000000e+00> : vector<2x16xf32>
    %121 = vector.multi_reduction <add>, %116, %cst_43 [2] : vector<2x16x32xf32> to vector<2x16xf32>
    %122 = vector.shape_cast %121 : vector<2x16xf32> to vector<2x16x1xf32>
    %cst_44 = arith.constant 3.200000e+01 : f32
    %123 = vector.broadcast %cst_44 : f32 to vector<2x16x1xf32>
    %124 = arith.divf %122, %123 : vector<2x16x1xf32>
    %125 = vector.broadcast %124 : vector<2x16x1xf32> to vector<2x16x32xf32>
    %126 = arith.subf %116, %125 : vector<2x16x32xf32>
    %127 = arith.mulf %126, %126 : vector<2x16x32xf32>
    %cst_45 = arith.constant dense<0.000000e+00> : vector<2x16xf32>
    %128 = vector.multi_reduction <add>, %127, %cst_45 [2] : vector<2x16x32xf32> to vector<2x16xf32>
    %129 = vector.shape_cast %128 : vector<2x16xf32> to vector<2x16x1xf32>
    %cst_46 = arith.constant 3.200000e+01 : f32
    %130 = vector.broadcast %cst_46 : f32 to vector<2x16x1xf32>
    %131 = arith.divf %129, %130 : vector<2x16x1xf32>
    %132 = vector.broadcast %124 : vector<2x16x1xf32> to vector<2x16x32xf32>
    %133 = arith.subf %116, %132 : vector<2x16x32xf32>
    %cst_47 = arith.constant 9.99999974E-6 : f32
    %134 = vector.broadcast %cst_47 : f32 to vector<2x16x1xf32>
    %135 = arith.addf %131, %134 : vector<2x16x1xf32>
    %136 = math.rsqrt %135 : vector<2x16x1xf32>
    %137 = vector.broadcast %136 : vector<2x16x1xf32> to vector<2x16x32xf32>
    %138 = arith.mulf %133, %137 : vector<2x16x32xf32>
    %139 = vector.shape_cast %118 : vector<1x32xf32> to vector<1x1x32xf32>
    %140 = vector.broadcast %139 : vector<1x1x32xf32> to vector<2x16x32xf32>
    %141 = arith.mulf %138, %140 : vector<2x16x32xf32>
    %142 = vector.shape_cast %120 : vector<1x32xf32> to vector<1x1x32xf32>
    %143 = vector.broadcast %142 : vector<1x1x32xf32> to vector<2x16x32xf32>
    %144 = arith.addf %141, %143 : vector<2x16x32xf32>
    %cst_48 = arith.constant 1.000000e+00 : f32
    %145 = vector.broadcast %cst_48 : f32 to vector<2x1x32xf32>
    %146 = arith.addf %145, %9 : vector<2x1x32xf32>
    %147 = vector.broadcast %146 : vector<2x1x32xf32> to vector<2x16x32xf32>
    %148 = arith.mulf %144, %147 : vector<2x16x32xf32>
    %149 = vector.broadcast %10 : vector<2x1x32xf32> to vector<2x16x32xf32>
    %150 = arith.addf %148, %149 : vector<2x16x32xf32>
    %151 = vector.shape_cast %150 : vector<2x16x32xf32> to vector<32x32xf32>
    %152 = arith.truncf %151 : vector<32x32xf32> to vector<32x32xbf16>
    %c0_49 = arith.constant 0 : index
    %c0_50 = arith.constant 0 : index
    %c0_51 = arith.constant 0 : index
    %153 = vector.load %arg17[%c0_49, %c0_50, %c0_51] : memref<1x32x128xbf16, #tpu.memory_space<vmem>>, vector<1x32x128xbf16>
    %154 = vector.shape_cast %153 : vector<1x32x128xbf16> to vector<32x128xbf16>
    %cst_52 = arith.constant dense<0.000000e+00> : vector<32x128xf32>
    %155 = tpu.matmul %152, %154, %cst_52 {dimension_numbers = #tpu.dot_dimension_numbers<[1], [0], [0], [1], [0, 0, 1, 1], [], []>} : vector<32x32xbf16>, vector<32x128xbf16>, vector<32x128xf32> -> vector<32x128xf32>
    %c0_53 = arith.constant 0 : index
    %c0_54 = arith.constant 0 : index
    %c0_55 = arith.constant 0 : index
    %156 = vector.load %arg18[%c0_53, %c0_54, %c0_55] : memref<1x1x128xf32, #tpu.memory_space<vmem>>, vector<1x1x128xf32>
    %157 = vector.shape_cast %156 : vector<1x1x128xf32> to vector<1x128xf32>
    %158 = vector.broadcast %157 : vector<1x128xf32> to vector<32x128xf32>
    %159 = arith.addf %155, %158 : vector<32x128xf32>
    %cst_56 = arith.constant 0.000000e+00 : f32
    %160 = vector.broadcast %cst_56 : f32 to vector<32x128xf32>
    %161 = arith.maximumf %159, %160 : vector<32x128xf32>
    %162 = arith.truncf %161 : vector<32x128xf32> to vector<32x128xbf16>
    %c0_57 = arith.constant 0 : index
    %c0_58 = arith.constant 0 : index
    %c0_59 = arith.constant 0 : index
    %163 = vector.load %arg19[%c0_57, %c0_58, %c0_59] : memref<1x128x32xbf16, #tpu.memory_space<vmem>>, vector<1x128x32xbf16>
    %164 = vector.shape_cast %163 : vector<1x128x32xbf16> to vector<128x32xbf16>
    %cst_60 = arith.constant dense<0.000000e+00> : vector<32x32xf32>
    %165 = tpu.matmul %162, %164, %cst_60 {dimension_numbers = #tpu.dot_dimension_numbers<[1], [0], [0], [1], [0, 0, 1, 1], [], []>} : vector<32x128xbf16>, vector<128x32xbf16>, vector<32x32xf32> -> vector<32x32xf32>
    %c0_61 = arith.constant 0 : index
    %c0_62 = arith.constant 0 : index
    %c0_63 = arith.constant 0 : index
    %166 = vector.load %arg20[%c0_61, %c0_62, %c0_63] : memref<1x1x32xf32, #tpu.memory_space<vmem>>, vector<1x1x32xf32>
    %167 = vector.shape_cast %166 : vector<1x1x32xf32> to vector<1x32xf32>
    %168 = vector.broadcast %167 : vector<1x32xf32> to vector<32x32xf32>
    %169 = arith.addf %165, %168 : vector<32x32xf32>
    %170 = vector.shape_cast %169 : vector<32x32xf32> to vector<2x16x32xf32>
    %171 = vector.broadcast %11 : vector<2x1x32xf32> to vector<2x16x32xf32>
    %172 = arith.mulf %170, %171 : vector<2x16x32xf32>
    %173 = arith.addf %116, %172 : vector<2x16x32xf32>
    %c0_64 = arith.constant 0 : index
    %c0_65 = arith.constant 0 : index
    %c0_66 = arith.constant 0 : index
    %174 = vector.load %arg26[%c0_64, %c0_65, %c0_66] : memref<2x16x32xf32, #tpu.memory_space<vmem>>, vector<2x16x32xf32>
    tpu.vector_store %arg26[%c0_64, %c0_65, %c0_66], %173 {strides = array<i32>} : memref<2x16x32xf32, #tpu.memory_space<vmem>>, vector<2x16x32xf32>,
    %c1_i32 = arith.constant 1 : i32
    %175 = arith.cmpi eq, %arg1, %c1_i32 : i32
    %176 = arith.extui %175 : i1 to i32
    %c0_i32_67 = arith.constant 0 : i32
    %177 = arith.cmpi ne, %176, %c0_i32_67 : i32
    scf.if %177 {
      %c0_68 = arith.constant 0 : index
      %c0_69 = arith.constant 0 : index
      %178 = vector.load %arg21[%c0_68, %c0_69] : memref<1x32xf32, #tpu.memory_space<vmem>>, vector<1x32xf32>
      %c0_70 = arith.constant 0 : index
      %c0_71 = arith.constant 0 : index
      %179 = vector.load %arg22[%c0_70, %c0_71] : memref<1x32xf32, #tpu.memory_space<vmem>>, vector<1x32xf32>
      %cst_72 = arith.constant dense<0.000000e+00> : vector<2x16xf32>
      %180 = vector.multi_reduction <add>, %173, %cst_72 [2] : vector<2x16x32xf32> to vector<2x16xf32>
      %181 = vector.shape_cast %180 : vector<2x16xf32> to vector<2x16x1xf32>
      %cst_73 = arith.constant 3.200000e+01 : f32
      %182 = vector.broadcast %cst_73 : f32 to vector<2x16x1xf32>
      %183 = arith.divf %181, %182 : vector<2x16x1xf32>
      %184 = vector.broadcast %183 : vector<2x16x1xf32> to vector<2x16x32xf32>
      %185 = arith.subf %173, %184 : vector<2x16x32xf32>
      %186 = arith.mulf %185, %185 : vector<2x16x32xf32>
      %cst_74 = arith.constant dense<0.000000e+00> : vector<2x16xf32>
      %187 = vector.multi_reduction <add>, %186, %cst_74 [2] : vector<2x16x32xf32> to vector<2x16xf32>
      %188 = vector.shape_cast %187 : vector<2x16xf32> to vector<2x16x1xf32>
      %cst_75 = arith.constant 3.200000e+01 : f32
      %189 = vector.broadcast %cst_75 : f32 to vector<2x16x1xf32>
      %190 = arith.divf %188, %189 : vector<2x16x1xf32>
      %191 = vector.broadcast %183 : vector<2x16x1xf32> to vector<2x16x32xf32>
      %192 = arith.subf %173, %191 : vector<2x16x32xf32>
      %cst_76 = arith.constant 9.99999974E-6 : f32
      %193 = vector.broadcast %cst_76 : f32 to vector<2x16x1xf32>
      %194 = arith.addf %190, %193 : vector<2x16x1xf32>
      %195 = math.rsqrt %194 : vector<2x16x1xf32>
      %196 = vector.broadcast %195 : vector<2x16x1xf32> to vector<2x16x32xf32>
      %197 = arith.mulf %192, %196 : vector<2x16x32xf32>
      %198 = vector.shape_cast %178 : vector<1x32xf32> to vector<1x1x32xf32>
      %199 = vector.broadcast %198 : vector<1x1x32xf32> to vector<2x16x32xf32>
      %200 = arith.mulf %197, %199 : vector<2x16x32xf32>
      %201 = vector.shape_cast %179 : vector<1x32xf32> to vector<1x1x32xf32>
      %202 = vector.broadcast %201 : vector<1x1x32xf32> to vector<2x16x32xf32>
      %203 = arith.addf %200, %202 : vector<2x16x32xf32>
      %204 = vector.shape_cast %203 : vector<2x16x32xf32> to vector<32x32xf32>
      %205 = arith.truncf %204 : vector<32x32xf32> to vector<32x32xbf16>
      %c0_77 = arith.constant 0 : index
      %c0_78 = arith.constant 0 : index
      %206 = vector.load %arg23[%c0_77, %c0_78] : memref<32x128xbf16, #tpu.memory_space<vmem>>, vector<32x128xbf16>
      %cst_79 = arith.constant dense<0.000000e+00> : vector<32x128xf32>
      %207 = tpu.matmul %205, %206, %cst_79 {dimension_numbers = #tpu.dot_dimension_numbers<[1], [0], [0], [1], [0, 0, 1, 1], [], []>} : vector<32x32xbf16>, vector<32x128xbf16>, vector<32x128xf32> -> vector<32x128xf32>
      %c0_80 = arith.constant 0 : index
      %c0_81 = arith.constant 0 : index
      %208 = vector.load %arg24[%c0_80, %c0_81] : memref<1x128xf32, #tpu.memory_space<vmem>>, vector<1x128xf32>
      %209 = vector.broadcast %208 : vector<1x128xf32> to vector<32x128xf32>
      %210 = arith.addf %207, %209 : vector<32x128xf32>
      %211 = vector.shape_cast %210 : vector<32x128xf32> to vector<2x16x128xf32>
      %c0_82 = arith.constant 0 : index
      %c0_83 = arith.constant 0 : index
      %c0_84 = arith.constant 0 : index
      %212 = vector.load %arg25[%c0_82, %c0_83, %c0_84] : memref<2x16x128xf32, #tpu.memory_space<vmem>>, vector<2x16x128xf32>
      tpu.vector_store %arg25[%c0_82, %c0_83, %c0_84], %211 {strides = array<i32>} : memref<2x16x128xf32, #tpu.memory_space<vmem>>, vector<2x16x128xf32>,
    } else {
    }
    return
  }
  func.func @transform_0(%arg0: i32, %arg1: i32) -> (i32, i32, i32) {
    %c0_i32 = arith.constant 0 : i32
    %c0_i32_0 = arith.constant 0 : i32
    %c0_i32_1 = arith.constant 0 : i32
    return %arg0, %c0_i32, %c0_i32_0 : i32, i32, i32
  }
  func.func @transform_1(%arg0: i32, %arg1: i32) -> (i32, i32) {
    %c0_i32 = arith.constant 0 : i32
    %c0_i32_0 = arith.constant 0 : i32
    %c0_i32_1 = arith.constant 0 : i32
    return %c0_i32, %c0_i32_0 : i32, i32
  }
  func.func @transform_2(%arg0: i32, %arg1: i32) -> (i32, i32) {
    %c0_i32 = arith.constant 0 : i32
    %c0_i32_0 = arith.constant 0 : i32
    %c0_i32_1 = arith.constant 0 : i32
    return %c0_i32, %c0_i32_0 : i32, i32
  }
  func.func @transform_3(%arg0: i32, %arg1: i32) -> (i32, i32) {
    %c0_i32 = arith.constant 0 : i32
    %c0_i32_0 = arith.constant 0 : i32
    %c0_i32_1 = arith.constant 0 : i32
    return %c0_i32, %c0_i32_0 : i32, i32
  }
  func.func @transform_4(%arg0: i32, %arg1: i32) -> (i32, i32) {
    %c0_i32 = arith.constant 0 : i32
    %c0_i32_0 = arith.constant 0 : i32
    %c0_i32_1 = arith.constant 0 : i32
    return %c0_i32, %c0_i32_0 : i32, i32
  }
  func.func @transform_5(%arg0: i32, %arg1: i32) -> (i32, i32) {
    %c0_i32 = arith.constant 0 : i32
    %c0_i32_0 = arith.constant 0 : i32
    %c0_i32_1 = arith.constant 0 : i32
    return %c0_i32, %c0_i32_0 : i32, i32
  }
  func.func @transform_6(%arg0: i32, %arg1: i32) -> (i32, i32, i32, i32) {
    %c0_i32 = arith.constant 0 : i32
    %c0_i32_0 = arith.constant 0 : i32
    %c0_i32_1 = arith.constant 0 : i32
    return %arg0, %arg1, %c0_i32, %c0_i32_0 : i32, i32, i32, i32
  }
  func.func @transform_7(%arg0: i32, %arg1: i32) -> (i32, i32, i32) {
    %c0_i32 = arith.constant 0 : i32
    %c0_i32_0 = arith.constant 0 : i32
    %c0_i32_1 = arith.constant 0 : i32
    return %arg1, %c0_i32, %c0_i32_0 : i32, i32, i32
  }
  func.func @transform_8(%arg0: i32, %arg1: i32) -> (i32, i32, i32) {
    %c0_i32 = arith.constant 0 : i32
    %c0_i32_0 = arith.constant 0 : i32
    %c0_i32_1 = arith.constant 0 : i32
    return %arg1, %c0_i32, %c0_i32_0 : i32, i32, i32
  }
  func.func @transform_9(%arg0: i32, %arg1: i32) -> (i32, i32, i32) {
    %c0_i32 = arith.constant 0 : i32
    %c0_i32_0 = arith.constant 0 : i32
    %c0_i32_1 = arith.constant 0 : i32
    return %arg1, %c0_i32, %c0_i32_0 : i32, i32, i32
  }
  func.func @transform_10(%arg0: i32, %arg1: i32) -> (i32, i32, i32) {
    %c0_i32 = arith.constant 0 : i32
    %c0_i32_0 = arith.constant 0 : i32
    %c0_i32_1 = arith.constant 0 : i32
    return %arg1, %c0_i32, %c0_i32_0 : i32, i32, i32
  }
  func.func @transform_11(%arg0: i32, %arg1: i32) -> (i32, i32, i32) {
    %c0_i32 = arith.constant 0 : i32
    %c0_i32_0 = arith.constant 0 : i32
    %c0_i32_1 = arith.constant 0 : i32
    return %arg1, %c0_i32, %c0_i32_0 : i32, i32, i32
  }
  func.func @transform_12(%arg0: i32, %arg1: i32) -> (i32, i32, i32) {
    %c0_i32 = arith.constant 0 : i32
    %c0_i32_0 = arith.constant 0 : i32
    %c0_i32_1 = arith.constant 0 : i32
    return %arg1, %c0_i32, %c0_i32_0 : i32, i32, i32
  }
  func.func @transform_13(%arg0: i32, %arg1: i32) -> (i32, i32, i32) {
    %c0_i32 = arith.constant 0 : i32
    %c0_i32_0 = arith.constant 0 : i32
    %c0_i32_1 = arith.constant 0 : i32
    return %arg1, %c0_i32, %c0_i32_0 : i32, i32, i32
  }
  func.func @transform_14(%arg0: i32, %arg1: i32) -> (i32, i32, i32) {
    %c0_i32 = arith.constant 0 : i32
    %c0_i32_0 = arith.constant 0 : i32
    %c0_i32_1 = arith.constant 0 : i32
    return %arg1, %c0_i32, %c0_i32_0 : i32, i32, i32
  }
  func.func @transform_15(%arg0: i32, %arg1: i32) -> (i32, i32, i32) {
    %c0_i32 = arith.constant 0 : i32
    %c0_i32_0 = arith.constant 0 : i32
    %c0_i32_1 = arith.constant 0 : i32
    return %arg1, %c0_i32, %c0_i32_0 : i32, i32, i32
  }
  func.func @transform_16(%arg0: i32, %arg1: i32) -> (i32, i32, i32) {
    %c0_i32 = arith.constant 0 : i32
    %c0_i32_0 = arith.constant 0 : i32
    %c0_i32_1 = arith.constant 0 : i32
    return %arg1, %c0_i32, %c0_i32_0 : i32, i32, i32
  }
  func.func @transform_17(%arg0: i32, %arg1: i32) -> (i32, i32, i32) {
    %c0_i32 = arith.constant 0 : i32
    %c0_i32_0 = arith.constant 0 : i32
    %c0_i32_1 = arith.constant 0 : i32
    return %arg1, %c0_i32, %c0_i32_0 : i32, i32, i32
  }
  func.func @transform_18(%arg0: i32, %arg1: i32) -> (i32, i32, i32) {
    %c0_i32 = arith.constant 0 : i32
    %c0_i32_0 = arith.constant 0 : i32
    %c0_i32_1 = arith.constant 0 : i32
    return %arg1, %c0_i32, %c0_i32_0 : i32, i32, i32
  }
  func.func @transform_19(%arg0: i32, %arg1: i32) -> (i32, i32) {
    %c0_i32 = arith.constant 0 : i32
    %c0_i32_0 = arith.constant 0 : i32
    %c0_i32_1 = arith.constant 0 : i32
    return %c0_i32, %c0_i32_0 : i32, i32
  }
  func.func @transform_20(%arg0: i32, %arg1: i32) -> (i32, i32) {
    %c0_i32 = arith.constant 0 : i32
    %c0_i32_0 = arith.constant 0 : i32
    %c0_i32_1 = arith.constant 0 : i32
    return %c0_i32, %c0_i32_0 : i32, i32
  }
  func.func @transform_21(%arg0: i32, %arg1: i32) -> (i32, i32) {
    %c0_i32 = arith.constant 0 : i32
    %c0_i32_0 = arith.constant 0 : i32
    %c0_i32_1 = arith.constant 0 : i32
    return %c0_i32, %c0_i32_0 : i32, i32
  }
  func.func @transform_22(%arg0: i32, %arg1: i32) -> (i32, i32) {
    %c0_i32 = arith.constant 0 : i32
    %c0_i32_0 = arith.constant 0 : i32
    %c0_i32_1 = arith.constant 0 : i32
    return %c0_i32, %c0_i32_0 : i32, i32
  }
  func.func @transform_23(%arg0: i32, %arg1: i32) -> (i32, i32, i32) {
    %c0_i32 = arith.constant 0 : i32
    %c0_i32_0 = arith.constant 0 : i32
    %c0_i32_1 = arith.constant 0 : i32
    return %arg0, %c0_i32, %c0_i32_0 : i32, i32, i32
  }
}

</mosaic_0001>

<bundles_post_ra>
// kernel: dit_forward.1
= control target key start
LH: loop header
LB: loop body
LE: loop exit
PB: predicated region body
PF: predicated region fallthrough
CT: control target
= control target key end

     0   :  { %s3797_s0 = inlined_call_operand.vmem [shape: f32[2,16,64], index: 0, kind: input, shape index: {}]   ;;  %s3798_s1 = inlined_call_operand.vmem [shape: bf16[64,64], index: 1, kind: input, shape index: {}]   ;;  %s3799_s2 = inlined_call_operand.vmem [shape: f32[1,64], index: 2, kind: input, shape index: {}]   ;;  %s3800_s3 = inlined_call_operand.vmem [shape: bf16[64,32], index: 3, kind: input, shape index: {}]   ;;  %s3801_s4 = inlined_call_operand.vmem [shape: f32[1,32], index: 4, kind: input, shape index: {}]   ;;  %s3802_s5 = inlined_call_operand.vmem [shape: f32[16,32], index: 5, kind: input, shape index: {}]   ;;  %s3803_s6 = inlined_call_operand.vmem [shape: f32[2,2,6,32], index: 6, kind: input, shape index: {}]   ;;  %s3804_s7 = inlined_call_operand.vmem [shape: f32[2,1,32], index: 7, kind: input, shape index: {}]   ;;  %s3805_s8 = inlined_call_operand.vmem [shape: f32[2,1,32], index: 8, kind: input, shape index: {}]   ;;  %s3806_s9 = inlined_call_operand.vmem [shape: bf16[2,32,192], index: 9, kind: input, shape index: {}]   ;;  %s3807_s10 = inlined_call_operand.vmem [shape: f32[2,1,192], index: 10, kind: input, shape index: {}]   ;;  %s3808_s11 = inlined_call_operand.vmem [shape: bf16[2,64,32], index: 11, kind: input, shape index: {}]   ;;  %s3809_s12 = inlined_call_operand.vmem [shape: f32[2,1,32], index: 12, kind: input, shape index: {}]   ;;  %s3810_s13 = inlined_call_operand.vmem [shape: f32[2,1,32], index: 13, kind: input, shape index: {}]   ;;  %s3811_s14 = inlined_call_operand.vmem [shape: f32[2,1,32], index: 14, kind: input, shape index: {}]   ;;  %s3812_s15 = inlined_call_operand.vmem [shape: bf16[2,32,128], index: 15, kind: input, shape index: {}]   ;;  %s3813_s16 = inlined_call_operand.vmem [shape: f32[2,1,128], index: 16, kind: input, shape index: {}]   ;;  %s3814_s17 = inlined_call_operand.vmem [shape: bf16[2,128,32], index: 17, kind: input, shape index: {}]   ;;  %s3815_s18 = inlined_call_operand.vmem [shape: f32[2,1,32], index: 18, kind: input, shape index: {}]   ;;  %s3816_s19 = inlined_call_operand.vmem [shape: f32[1,32], index: 19, kind: input, shape index: {}]   ;;  %s3817_s20 = inlined_call_operand.vmem [shape: f32[1,32], index: 20, kind: input, shape index: {}]   ;;  %s3818_s21 = inlined_call_operand.vmem [shape: bf16[32,128], index: 21, kind: input, shape index: {}]   ;;  %s3819_s22 = inlined_call_operand.vmem [shape: f32[1,128], index: 22, kind: input, shape index: {}]   ;;  %s3820_s23 = inlined_call_operand.vmem [shape: f32[2,16,128], index: 23, kind: output, shape index: {}]  }
   0x1   :  { %3831 = sst [smem:[#allocation9_spill]] %s3797_s0 }
   0x2   :  { %3832 = sst [smem:[#allocation10_spill]] %s3798_s1 }
   0x3   :  { %3833 = sst [smem:[#allocation11_spill]] %s3799_s2 }
   0x4   :  { %3834 = sst [smem:[#allocation12_spill]] %s3800_s3 }
   0x5   :  { %3835 = sst [smem:[#allocation13_spill]] %s3801_s4 }
   0x6   :  { %3836 = sst [smem:[#allocation14_spill]] %s3802_s5 }
   0x7   :  { %3837 = sst [smem:[#allocation15_spill]] %s3803_s6 }
   0x8   :  { %3838 = sst [smem:[#allocation16_spill]] %s3804_s7 }
   0x9   :  { %3839 = sst [smem:[#allocation17_spill]] %s3806_s9 }
   0xa   :  { %3840 = sst [smem:[#allocation18_spill]] %s3807_s10 }
   0xb   :  { %3841 = sst [smem:[#allocation19_spill]] %s3816_s19 }
   0xc   :  { %3842 = sst [smem:[#allocation20_spill]] %s3817_s20 }
   0xd   :  { %3843 = sst [smem:[#allocation21_spill]] %s3818_s21 }
   0xe   :  { %3844 = sst [smem:[#allocation22_spill]] %s3819_s22 }
   0xf   :  { %3845 = sst [smem:[#allocation23_spill]] %s3820_s23 }
  0x10   :  { %s3335_s4 = smov 0   ;;  %s3337_s30 = smov 0  }
  0x11   :  { %s3339_s24 = smov 0   ;;  %s3341_s25 = smov 0  }
  0x12   :  { %s3343_s5 = smov 0  }
  0x13 LB: > { %3846 = sst [smem:[#allocation4_spill]] %s3195_s30  ;;  %s42_s1 = sadd.s32 1, %s3203_s25  ;;  %s3207_s5 = sphi %s3343_s5, %s33_s5   ;;  %s3203_s25 = sphi %s3341_s25, %s3880_s25   ;;  %s3199_s24 = sphi %s3339_s24, %s3879_s24   ;;  %s3195_s30 = sphi %s3337_s30, %s3878_s30   ;;  %s3191_s4 = sphi %s3335_s4, %s3877_s4  }
  0x14   : > { %3847 = sst [smem:[#allocation5_spill]] %s3203_s25  ;;  %p43_p0 = scmp.ge.s32.totalorder %s42_s1, 2 }
  0x15   : > { %3848 = sst [smem:[#allocation6_spill]] %s3207_s5  ;;  %p192_p1 = scmp.ne.s32.totalorder %s3195_s30, %s3191_s4 }
  0x16   : > { %p193_p2 = scmp.eq.s32.totalorder %s3207_s5, 0  ;;  %s3882_s1 = smov (%p43_p0, %s42_s1), 0 }
  0x17   : > { %3849 = sst [smem:[#allocation7_spill]] %s3882_s1  ;;  %s181_s26 = ssub.s32 %s3203_s25, %s3882_s1 }
  0x18   : > { %p194_p3 = por %p193_p2, %p192_p1  ;;  %s185_s2 = sadd.s32 1, %s3195_s30 }
  0x19   : > { %p183_p4 = scmp.eq.s32.totalorder %s181_s26, 0  ;;  %p2761_p5 = scmp.ge.s32.totalorder %s3207_s5, 2 }
  0x1b   : > { %s3370_s6 = scalar_select %p183_p4, %s3195_s30, %s185_s2  }
  0x1c   : > { %677 = sbr.rel (%p2761_p5) target bundleno = 46 (0x2e), region = 56 }
  0x1d   : > { %3850 = sst [smem:[#allocation8_spill]] %s3370_s6 }
  0x23   : > { %680 = sbr.rel (!%p194_p3) target bundleno = 46 (0x2e), region = 60  ;;  %s682_s27 = sand.u32 (%p194_p3), 1, %s3195_s30  }
  0x24   : > { %s2763_s7 = sshll.u32 (%p194_p3), %s3203_s25, 3  ;;  %s2762_s28 = sshll.u32 (%p194_p3), %s682_s27, 4 }
  0x25   : > { %s3851_s0 = sld [smem:[#allocation15_spill]] (%p194_p3)  ;;  %s684_s1 = scalar_lea.vmem (%p194_p3), [#allocation3], %s2762_s28 }
  0x2b   : > { %s689_s23 = scalar_lea.vmem %s3851_s0, %s2763_s7 }
  0x2c   : > { %v719_v0 = vld [vmem:[%s689_s23] sm:$0xff]  ;;  %v721_v1 = vld [vmem:[%s689_s23 + $0x10] sm:$0xff] }
  0x2d   : > { %720 = vst [vmem:[%s684_s1] sm:$0xff] %v719_v0  ;;  %722 = vst [vmem:[%s684_s1 + $0x8] sm:$0xff] %v721_v1 }
  0x2e PF: > { %p2764_p6 = scmp.ge.s32.totalorder %s3207_s5, 1  ;;  %p808_p7 = scmp.lt.s32.totalorder %s3207_s5, 3 }
  0x30   : > { %p809_p8 = pnand %p2764_p6, %p808_p7 }
  0x31   : > { %s815_s26 = sand.u32 (!%p809_p8), 1, %s3191_s4   ;;  %p938_p9 = scmp.lt.s32.totalorder (!%p809_p8), %s3199_s24, 1 }
  0x32   : > { %812 = sbr.rel (%p809_p8) target bundleno = 3715 (0xe83), region = 146  ;;  %s3382_s2 = sshll.u32 (!%p809_p8), %s815_s26, 4 }
  0x33   : > { %s3853_s9 = sld [smem:[#allocation17_spill]] (!%p809_p8)  ;;  %s3854_s10 = sld [smem:[#allocation18_spill]] (!%p809_p8) }
  0x34   : > { %s817_s23 = scalar_lea.vmem (!%p809_p8), [#allocation3], %s3382_s2  ;;  %p2775_p10 = scmp.ne.s32.totalorder (!%p809_p8), %s3199_s24, 0 }
  0x39   : > { %s3385_s27 = scalar_select %p938_p9, %s3199_s24, 1 }
  0x3a   : > { %994 = sbr.rel (%p2775_p10) target bundleno = 526 (0x20e), region = 154  ;;  %s3856_s29 = sld [smem:[#allocation9_spill]] (!%p2775_p10)  ;;  %vm1040_vm0 = vcmask (!%p2775_p10), 523264   ;;  %vm1198_vm1 = vcmask (!%p2775_p10), 261120  }
  0x3b   : > { %s2841_s0 = sshll.u32 %s3385_s27, 5  ;;  %s2768_s26 = sshll.u32 %s3385_s27, 1 }
  0x3c   : > { %s3400_s1 = scalar_lea.vmem %s3853_s9, %s2841_s0  ;;  %s3405_s5 = scalar_lea.vmem %s3854_s10, %s2768_s26 }
  0x3d   : > { %s3410_s7 = scalar_lea.vmem %s3808_s11, %s2841_s0  ;;  %s2843_s30 = sshll.u32 %s3385_s27, 4 }
  0x3e   : > { %s3432_s0 = scalar_lea.vmem %s3812_s15, %s2843_s30  ;;  %s2844_s28 = sshll.u32 %s3385_s27, 6 }
  0x3f   : > { %s3438_s19 = scalar_lea.vmem %s3814_s17, %s2844_s28  ;;  %s3855_s10 = sld [smem:[#allocation10_spill]] (!%p2775_p10) }
  0x40   : > { %v995_v5 = vld [vmem:[%s3856_s29] sm:$0xff] (!%p2775_p10)  ;;  %v996_v6 = vld [vmem:[%s3856_s29 + $0x8] sm:$0xff] (!%p2775_p10)  ;;  %s3857_s30 = sld [smem:[#allocation12_spill]] (!%p2775_p10)  ;;  %v997_v11 = vld [vmem:[%s3856_s29 + $0x10] sm:$0xff] (!%p2775_p10)  ;;  %s3859_s9 = sld [smem:[#allocation11_spill]] (!%p2775_p10) }
  0x41   : > { %v999_v7 = vpack.c.bf16 %v996_v6, %v995_v5  ;;  %v998_v12 = vld [vmem:[%s3856_s29 + $0x18] sm:$0xff]  ;;  %s3860_s6 = sld [smem:[#allocation13_spill]] }
  0x42   : > { %v1000_v13 = vpack.c.bf16 %v998_v12, %v997_v11 }
  0x43   : > { %2905 = vmatprep.mubr.msk.bf16.mxu0 %vm1040_vm0, %v999_v7 }
  0x45   : > { %v3063_v2 = vld [vmem:[%s3855_s10] sm:$0xff]   ;;  %v3064_v3 = vld [vmem:[%s3855_s10 + $0x8] sm:$0xff]   ;;  %v3065_v4 = vld [vmem:[%s3855_s10 + $0x10] sm:$0xff]  }
  0x46   : > { %2897 = vmatprep.subr.bf16.mxu0 %v3063_v2  ;;  %s3858_s20 = smov %s3857_s30  ;;  %v3067_v8 = vld [vmem:[%s3857_s30] sm:$0xff]   ;;  %v3066_v10 = vld [vmem:[%s3855_s10 + $0x18] sm:$0xff]   ;;  %s3861_s30 = sld [smem:[#allocation14_spill]] }
  0x47   : > { %2898 = vmatpush3.bf16.msra.mxu0 %v3063_v2  ;;  %v3068_v9 = vld [vmem:[%s3858_s20 + $0x8] sm:$0xff]   ;;  %2909 = vmatprep.subr.bf16.mxu1 %v3067_v8  ;;  %v3069_v14 = vld [vmem:[%s3858_s20 + $0x10] sm:$0xff]   ;;  %v3070_v15 = vld [vmem:[%s3858_s20 + $0x18] sm:$0xff]  }
  0x48   : > { %2899 = vmatprep.subr.bf16.mxu0 %v3064_v3  ;;  %2910 = vmatpush3.bf16.msra.mxu1 %v3067_v8  ;;  %v2776_v17 = vld [vmem:[%s3859_s9] ss:$0 sm:$0xff] }
  0x49   : > { %2911 = vmatprep.subr.bf16.mxu1 %v3068_v9  ;;  %v2783_v27 = vld [vmem:[%s3860_s6] ss:$0 sm:$0xff] }
  0x4b   : > { %2900 = vmatpush3.bf16.msra.mxu0 %v3064_v3 }
  0x4c   : > { %2901 = vmatprep.subr.bf16.mxu0 %v3065_v4  ;;  %2912 = vmatpush3.bf16.msra.mxu1 %v3068_v9  ;;  %s3862_s3 = smov %s3861_s30  ;;  %v1192_v29 = vld [vmem:[%s3861_s30] sm:$0xff] }
  0x4d   : > { %2913 = vmatprep.subr.bf16.mxu1 %v3069_v14  ;;  %v1193_v34 = vld [vmem:[%s3862_s3 + $0x8] sm:$0xff] }
  0x4f   : > { %2902 = vmatpush3.bf16.msra.mxu0 %v3065_v4 }
  0x50   : > { %2903 = vmatprep.subr.bf16.mxu0 %v3066_v10  ;;  %2914 = vmatpush3.bf16.msra.mxu1 %v3069_v14 }
  0x51   : > { %2915 = vmatprep.subr.bf16.mxu1 %v3070_v15 }
  0x53   : > { %2904 = vmatpush3.bf16.msra.mxu0 %v3066_v10 }
  0x54   : > { %2916 = vmatpush3.bf16.msra.mxu1 %v3070_v15 }
  0x56   : > { %2906 = vmatmul.mubr.msk.bf16.vlgmr.msra.gmra.mrb[0].mxu0 %vm1040_vm0, %v1000_v13 }
 0x129   : > { %v2907_v16 = vpop.f32.mrb[0].mxu0 }
 0x12a   : > { %v1081_v18 = vpop.f32.mrb[1].mxu0  ;;  %v1090_v20 = vadd.f32 %v2907_v16, %v2776_v17 }
 0x12b   : > { %v2908_v19 = vpop.f32.mrb[2].mxu0  ;;  %v1082_v23 = vadd.f32 %v2776_v17, %v1081_v18 }
 0x12c   : > { %v1093_v21 = vadd.f32 %v2908_v19, %v2776_v17  ;;  %v1084_v22 = vpop.f32.mrb[3].mxu0 }
 0x12d   : > { %v1085_v24 = vadd.f32 %v2776_v17, %v1084_v22 }
 0x12e   : > { %v1097_v25 = vpack.c.bf16 %v1093_v21, %v1090_v20 }
 0x12f   : > { %v1096_v26 = vpack.c.bf16 %v1085_v24, %v1082_v23 }
 0x131   : > { %2917 = vmatprep.mubr.msk.bf16.mxu1 %vm1040_vm0, %v1096_v26 }
 0x132   : > { %2918 = vmatmul.mubr.msk.bf16.vlgmr.msra.gmra.mrb[0].mxu1 %vm1040_vm0, %v1097_v25 }
 0x205   : > { %v2919_v28 = vpop.f32.mrb[0].mxu1 }
 0x206   : > { %v1186_v30 = vadd.f32 %v2919_v28, %v2783_v27  ;;  %v1177_v31 = vpop.f32.mrb[1].mxu1 }
 0x207   : > { %v1178_v32 = vadd.f32 %v2783_v27, %v1177_v31  ;;  %v2920_v33 = vpop.f32.mrb[2].mxu1 }
 0x208   : > { %v1196_v35 = vadd.f32 %v1192_v29, %v1186_v30  ;;  %v1189_v36 = vadd.f32 %v2920_v33, %v2783_v27  ;;  %v1180_v37 = vpop.f32.mrb[3].mxu1 }
 0x209   : > { %v1194_v38 = vadd.f32 %v1192_v29, %v1178_v32  ;;  %v1181_v39 = vadd.f32 %v2783_v27, %v1180_v37 }
 0x20a   : > { %1201 = vst.msk [vmem:[#allocation2 + $0x10] sm:$0xff] %vm1198_vm1, %v1196_v35  ;;  %v1197_v40 = vadd.f32 %v1193_v34, %v1189_v36 }
 0x20b   : > { %1199 = vst.msk [vmem:[#allocation2] sm:$0xff] %vm1198_vm1, %v1194_v38  ;;  %v1195_v41 = vadd.f32 %v1193_v34, %v1181_v39 }
 0x20c   : > { %1202 = vst.msk [vmem:[#allocation2 + $0x18] sm:$0xff] %vm1198_vm1, %v1197_v40 }
 0x20d   : > { %1200 = vst.msk [vmem:[#allocation2 + $0x8] sm:$0xff] %vm1198_vm1, %v1195_v41 }
 0x20e PF: > { %vm1211_vm2 = vcmask 261120   ;;  %v3091_v6 = vld [vmem:[%s3400_s1 + $0x4] ss:$8 sps:$4 sm:$0xff]   ;;  %v3093_v7 = vld [vmem:[%s3400_s1] ss:$8 sps:$4 sm:$0xff]   ;;  %v3209_v10 = vmov 0   ;;  %v1287_v21 = vlaneseq  ;;  %s3865_s26 = scalar_lea.vmem %s3805_s8, %s3385_s27  ;;  %s3866_s22 = scalar_lea.vmem %s3809_s12, %s3385_s27 }
 0x20f   : > { %1355 = vmatprep.subr.bf16.mxu0 %v3091_v6  ;;  %v3094_v8 = vld [vmem:[%s3400_s1 + $0x14] ss:$8 sps:$4 sm:$0xff]   ;;  %v3096_v9 = vld [vmem:[%s3400_s1 + $0x10] ss:$8 sps:$4 sm:$0xff]   ;;  %1387 = vmatprep.mubr.bf16.mxu0 %v3209_v10  ;;  %s3863_s28 = sld [smem:[#allocation16_spill]]  ;;  %s3210_s2 = smov 96  }
 0x210   : > { %1356 = vmatpush1.bf16.msra.mxu0 %v3093_v7  ;;  %v3526_v24 = vshrl.u32 %v1287_v21, 7  ;;  %v3530_v25 = vld [vmem:[%s817_s23] sm:$0x3f]  ;;  %v3550_v39 = vld [vmem:[%s817_s23 + $0x8] sm:$0x3f]  ;;  %vm3212_vm3 = vmmov 0   ;;  %s3867_s1 = scalar_lea.vmem %s3810_s13, %s3385_s27 }
 0x211   : > { %v3500_v43 = vld [vmem:[#allocation2 + $0x10] sm:$0xff]  ;;  %1357 = vmatprep.subr.bf16.mxu0 %v3094_v8  ;;  %v3538_v29 = vadd.f32 1.0, %v3530_v25  ;;  %v2791_v31 = vld [vmem:[%s3865_s26] ss:$0 sm:$0xff]  ;;  %vm1660_vm4 = vcmask 130048   ;;  %s3214_s23 = smov 32   ;;  %s3869_s26 = scalar_lea.vmem %s3813_s16, %s3385_s27 }
 0x212   : > { %v3498_v42 = vld [vmem:[#allocation2] sm:$0xff]  ;;  %v1218_v46 = vsel %vm1211_vm2, %v3500_v43, 0.0  ;;  %v1289_v30 = vsub.s32 0, %v3526_v24  ;;  %v1301_v34 = vsub.s32 1, %v3526_v24  ;;  %vm1990_vm5 = vcmask 523264   ;;  %p2829_p11 = scmp.ne.s32.totalorder %s3199_s24, 1 }
 0x213   : > { %v1212_v45 = vsel %vm1211_vm2, %v3498_v42, 0.0  ;;  %v3508_v47 = vld [vmem:[#allocation2 + $0x18] sm:$0xff]  ;;  %1219 = vadd.xlane.f32.xlu1 %v1218_v46  ;;  %s3872_s25 = sld [smem:[#allocation19_spill]] (!%p2829_p11)  ;;  %s3874_s21 = sld [smem:[#allocation22_spill]] (!%p2829_p11) }
 0x214   : > { %v3502_v44 = vld [vmem:[#allocation2 + $0x8] sm:$0xff]  ;;  %1213 = vadd.xlane.f32.xlu0 %v1212_v45  ;;  %v1221_v49 = vsel %vm1211_vm2, %v3508_v47, 0.0  ;;  %1358 = vmatpush1.bf16.msra.mxu0 %v3096_v9  ;;  %v1290_v38 = vrot.slane %v3538_v29, %v1289_v30  ;;  %v1302_v46 = vrot.slane %v3530_v25, %v1301_v34 }
 0x215   : > { %v1215_v48 = vsel %vm1211_vm2, %v3502_v44, 0.0  ;;  %s3864_s4 = scalar_lea.vmem %s3863_s28, %s3385_s27  ;;  %s3873_s28 = sld [smem:[#allocation20_spill]] (!%p2829_p11) }
 0x216   : > { %v2790_v27 = vld [vmem:[%s3864_s4] ss:$0 sm:$0xff]  ;;  %s3868_s4 = scalar_lea.vmem %s3811_s14, %s3385_s27 }
 0x217   : > { %1222 = vadd.xlane.f32.xlu1 %v1221_v49 }
 0x218   : > { %1216 = vadd.xlane.f32.xlu0 %v1215_v48  ;;  %v3554_v48 = vadd.f32 1.0, %v3550_v39 }
 0x2a0   : > { %v1220_v51 = vpop.xlane.xlu1 %1219 }
 0x2a1   : > { %v1214_v50 = vpop.xlane.xlu0 %1213  ;;  %v1227_v53 = vmul.f32 0.03125, %v1220_v51 }
 0x2a2   : > { %v1225_v52 = vmul.f32 0.03125, %v1214_v50 }
 0x2a3   : > { %v1231_v55 = vsub.f32 %v3500_v43, %v1227_v53 }
 0x2a4   : > { %v1229_v54 = vsub.f32 %v3498_v42, %v1225_v52  ;;  %v1223_v57 = vpop.xlane.xlu1 %1222 }
 0x2a5   : > { %v1217_v56 = vpop.xlane.xlu0 %1216  ;;  %v1228_v59 = vmul.f32 0.03125, %v1223_v57  ;;  %v1235_v61 = vmul.f32 %v1231_v55, %v1231_v55 }
 0x2a6   : > { %v1226_v58 = vmul.f32 0.03125, %v1217_v56  ;;  %v1233_v60 = vmul.f32 %v1229_v54, %v1229_v54  ;;  %v1294_v56 = vrot.slane %v3554_v48, %v1289_v30 }
 0x2a7   : > { %v1232_v63 = vsub.f32 %v3508_v47, %v1228_v59  ;;  %v1243_v1 = vsel %vm1211_vm2, %v1235_v61, 0.0 }
 0x2a8   : > { %v1230_v62 = vsub.f32 %v3502_v44, %v1226_v58  ;;  %v1237_v0 = vsel %vm1211_vm2, %v1233_v60, 0.0 }
 0x2a9   : > { %1238 = vadd.xlane.f32.xlu0 %v1237_v0  ;;  %v1236_v3 = vmul.f32 %v1232_v63, %v1232_v63  ;;  %v1306_v0 = vrot.slane %v3550_v39, %v1301_v34 }
 0x2aa   : > { %v1234_v2 = vmul.f32 %v1230_v62, %v1230_v62 }
 0x2ab   : > { %v1246_v5 = vsel %vm1211_vm2, %v1236_v3, 0.0  ;;  %v1317_v3 = vld [vmem:[%s3405_s5] sm:$0x3]  ;;  %s3213_s5 = smov 64  }
 0x2ac   : > { %v1240_v4 = vsel %vm1211_vm2, %v1234_v2, 0.0  ;;  %v1326_v6 = vrot.slane %v1317_v3, %v1301_v34 }
 0x2ad   : > { %1244 = vadd.xlane.f32.xlu0 %v1243_v1  ;;  %1241 = vadd.xlane.f32.xlu1 %v1240_v4  ;;  %v1322_v4 = vrot.slane %v1317_v3, %v1289_v30 }
 0x2b1   : > { %1247 = vadd.xlane.f32.xlu1 %v1246_v5 }
 0x336   : > { %v1239_v11 = vpop.xlane.xlu0 %1238 }
 0x337   : > { %v1249_v12 = vmul.f32 0.03125, %v1239_v11 }
 0x339   : > { %v1253_v13 = vadd.f32 1e-05, %v1249_v12 }
 0x33a   : > { %v1242_v14 = vpop.xlane.xlu1 %1241  ;;  %v1245_v15 = vpop.xlane.xlu0 %1244 }
 0x33b   : > { %3111 = vrsqrt.f32 %v1253_v13  ;;  %v1250_v16 = vmul.f32 0.03125, %v1242_v14  ;;  %v1251_v17 = vmul.f32 0.03125, %v1245_v15 }
 0x33d   : > { %v1254_v18 = vadd.f32 1e-05, %v1250_v16  ;;  %v1255_v19 = vadd.f32 1e-05, %v1251_v17 }
 0x33e   : > { %v1248_v20 = vpop.xlane.xlu1 %1247 }
 0x33f   : > { %3113 = vrsqrt.f32 %v1254_v18  ;;  %v1252_v22 = vmul.f32 0.03125, %v1248_v20 }
 0x340   : > { %3115 = vrsqrt.f32 %v1255_v19 }
 0x341   : > { %v1256_v23 = vadd.f32 1e-05, %v1252_v22 }
 0x343   : > { %3117 = vrsqrt.f32 %v1256_v23 }
 0x345   : > { %v3112_v26 = vpop.eup %3111 }
 0x346   : > { %v1261_v28 = vmul.f32 %v3112_v26, %v1229_v54 }
 0x348   : > { %v1271_v32 = vmul.f32 %v2790_v27, %v1261_v28 }
 0x349   : > { %v3114_v33 = vpop.eup %3113 }
 0x34a   : > { %v3116_v35 = vpop.eup %3115  ;;  %v1262_v36 = vmul.f32 %v3114_v33, %v1230_v62  ;;  %v1281_v37 = vadd.f32 %v2791_v31, %v1271_v32 }
 0x34b   : > { %v1263_v40 = vmul.f32 %v3116_v35, %v1231_v55 }
 0x34c   : > { %v1272_v41 = vmul.f32 %v2790_v27, %v1262_v36  ;;  %v1295_v52 = vmul.f32 %v1290_v38, %v1281_v37  ;;  %v3211_v37 = vmov 0.0  }
 0x34d   : > { %v3118_v45 = vpop.eup %3117  ;;  %v1273_v49 = vmul.f32 %v2790_v27, %v1263_v40  ;;  %2927 = vmatprep.subr.bf16.mxu1 %v3211_v37  ;;  %2921 = vmatprep.subr.bf16.mxu0 %v3211_v37 }
 0x34e   : > { %v1264_v50 = vmul.f32 %v3118_v45, %v1232_v63  ;;  %v1282_v51 = vadd.f32 %v2791_v31, %v1272_v41  ;;  %v1307_v57 = vadd.f32 %v1302_v46, %v1295_v52  ;;  %2929 = vmatprep.mubr.msk.bf16.mxu1 %vm3212_vm3, %v3211_v37 }
 0x34f   : > { %v1283_v59 = vadd.f32 %v2791_v31, %v1273_v49 }
 0x350   : > { %v1274_v53 = vmul.f32 %v2790_v27, %v1264_v50  ;;  %v1296_v54 = vmul.f32 %v1290_v38, %v1282_v51 }
 0x351   : > { %v1297_v62 = vmul.f32 %v1294_v56, %v1283_v59 }
 0x352   : > { %v1308_v58 = vadd.f32 %v1302_v46, %v1296_v54  ;;  %v1284_v55 = vadd.f32 %v2791_v31, %v1274_v53 }
 0x353   : > { %v1309_v1 = vadd.f32 %v1306_v0, %v1297_v62 }
 0x354   : > { %v1311_v60 = vpack.c.bf16 %v1308_v58, %v1307_v57  ;;  %v1298_v61 = vmul.f32 %v1294_v56, %v1284_v55 }
 0x356   : > { %2796 = vmatmul.mubr.msk.bf16.vlgmr.msra.gmra.mrb[0].mxu0 %vm1211_vm2, %v1311_v60  ;;  %v1310_v63 = vadd.f32 %v1306_v0, %v1298_v61 }
 0x357   : > { %1397 = vmatprep.mubr.bf16.mxu0 %v3209_v10 }
 0x358   : > { %v1312_v2 = vpack.c.bf16 %v1310_v63, %v1309_v1 }
 0x35e   : > { %2797 = vmatmul.mubr.msk.bf16.gmra.mrb[4].mxu0 %vm1211_vm2, %v1312_v2 }
 0x35f   : > { %2923 = vmatprep.mubr.msk.bf16.mxu0 %vm3212_vm3, %v3211_v37 }
 0x429   : > { %v1389_v5 = vpop.f32.mrb[0].mxu0 }
 0x42a   : > { %v1390_v7 = vadd.f32 %v1389_v5, %v1322_v4  ;;  %v1391_v8 = vpop.f32.mrb[1].mxu0 }
 0x42b   : > { %v1393_v9 = vpop.f32.mrb[2].mxu0  ;;  %v3562_v13 = vadd.f32 %v1391_v8, %v1326_v6 }
 0x42c   : > { %v1394_v11 = vadd.f32 %v1393_v9, %v1322_v4  ;;  %v1395_v12 = vpop.f32.mrb[3].mxu0  ;;  %1412 = vrot.lane.b32.xlu0 %v1390_v7, %s3210_s2  ;;  %v1424_v14 = vmul.f32 0.25, %v1390_v7 }
 0x42d   : > { %v3564_v10 = vadd.f32 %v1395_v12, %v1326_v6 }
 0x42e   : > { %v1425_v15 = vmul.f32 0.25, %v1394_v11  ;;  %1414 = vrot.lane.b32.xlu1 %v1394_v11, %s3210_s2  ;;  %v1436_v16 = vpack.c.bf16 %v1394_v11, %v1390_v7 }
 0x42f   : > { %v3071_v17 = vpack.i.bf16 %v3564_v10, %v3562_v13  ;;  %v1456_v18 = vpack.c.bf16 %v3564_v10, %v3562_v13 }
 0x430   : > { %v1432_v19 = vpack.c.bf16 %v1425_v15, %v1424_v14 }
 0x431   : > { %v1399_v20 = vpop.f32.mrb[4].mxu0 }
 0x432   : > { %v1400_v21 = vadd.f32 %v1399_v20, %v1322_v4  ;;  %v1401_v22 = vpop.f32.mrb[5].mxu0 }
 0x433   : > { %v3571_v23 = vadd.f32 %v1401_v22, %v1326_v6  ;;  %v1403_v26 = vpop.f32.mrb[6].mxu0 }
 0x434   : > { %v1404_v27 = vadd.f32 %v1403_v26, %v1322_v4  ;;  %v1405_v28 = vpop.f32.mrb[7].mxu0  ;;  %1416 = vrot.lane.b32.xlu1 %v1400_v21, %s3210_s2  ;;  %v1428_v31 = vmul.f32 0.25, %v1400_v21 }
 0x435   : > { %v3574_v30 = vadd.f32 %v1405_v28, %v1326_v6 }
 0x436   : > { %v1429_v32 = vmul.f32 0.25, %v1404_v27  ;;  %v1438_v33 = vpack.c.bf16 %v1404_v27, %v1400_v21 }
 0x437   : > { %v3076_v34 = vpack.i.bf16 %v3574_v30, %v3571_v23  ;;  %v1458_v35 = vpack.c.bf16 %v3574_v30, %v3571_v23  ;;  %v3100_v30 = vld [vmem:[%s3410_s7 + $0x18] sm:$0xff]  }
 0x438   : > { %v1434_v36 = vpack.c.bf16 %v1429_v32, %v1428_v31  ;;  %1418 = vrot.lane.b32.xlu1 %v1404_v27, %s3210_s2 }
 0x49e   : > { %v1413_v38 = vpop.permute.xlu0 %1412 }
 0x49f   : > { %v1426_v54 = vmul.f32 0.25, %v1413_v38 }
 0x4a0   : > { %v1415_v40 = vpop.permute.xlu1 %1414 }
 0x4a1   : > { %v1437_v41 = vpack.c.bf16 %v1415_v40, %v1413_v38  ;;  %v1427_v52 = vmul.f32 0.25, %v1415_v40 }
 0x4a3   : > { %1511 = vrot.lane.b32.xlu0 %v1437_v41, %s3213_s5  ;;  %v1433_v57 = vpack.c.bf16 %v1427_v52, %v1426_v54 }
 0x4a6   : > { %v1417_v45 = vpop.permute.xlu1 %1416 }
 0x4a7   : > { %1461 = vrot.lane.b32.xlu0 %v1436_v16, %s3213_s5  ;;  %v1430_v61 = vmul.f32 0.25, %v1417_v45 }
 0x4aa   : > { %v1419_v46 = vpop.permute.xlu1 %1418 }
 0x4ab   : > { %v1439_v49 = vpack.c.bf16 %v1419_v46, %v1417_v45  ;;  %v1431_v55 = vmul.f32 0.25, %v1419_v46 }
 0x4ad   : > { %1611 = vrot.lane.b32.xlu1 %v1439_v49, %s3213_s5  ;;  %v1435_v0 = vpack.c.bf16 %v1431_v55, %v1430_v61 }
 0x4b1   : > { %1561 = vrot.lane.b32.xlu1 %v1438_v33, %s3213_s5  ;;  %s3870_s5 = scalar_lea.vmem %s3815_s18, %s3385_s27 }
 0x515   : > { %v1512_v50 = vpop.permute.xlu0 %1511 }
 0x516   : > { %v1517_v51 = vsel %vm1211_vm2, %v1512_v50, 0 }
 0x517   : > { %2928 = vmatpush3.bf16.xpose.msra.mxu1 %v1517_v51 }
 0x518   : > { %2939 = vmatprep.subr.bf16.mxu1 %v3211_v37 }
 0x519   : > { %v1462_v53 = vpop.permute.xlu0 %1461 }
 0x51a   : > { %v1467_v56 = vsel %vm1211_vm2, %v1462_v53, 0 }
 0x51b   : > { %2922 = vmatpush3.bf16.xpose.msra.mxu0 %v1467_v56 }
 0x51c   : > { %2933 = vmatprep.subr.bf16.mxu0 %v3211_v37 }
 0x51e   : > { %2930 = vmatmul.mubr.msk.bf16.vlgmr.msra.gmra.mrb[0].mxu1 %vm1211_vm2, %v1433_v57 }
 0x51f   : > { %v1612_v58 = vpop.permute.xlu1 %1611  ;;  %2941 = vmatprep.mubr.msk.bf16.mxu1 %vm3212_vm3, %v3211_v37 }
 0x520   : > { %v1617_v59 = vsel %vm1211_vm2, %v1612_v58, 0 }
 0x521   : > { %2940 = vmatpush3.bf16.xpose.msra.mxu1 %v1617_v59 }
 0x522   : > { %2924 = vmatmul.mubr.msk.bf16.vlgmr.msra.gmra.mrb[8].mxu0 %vm1211_vm2, %v1432_v19  ;;  %2951 = vmatprep.subr.bf16.mxu1 %v3211_v37 }
 0x523   : > { %v1562_v60 = vpop.permute.xlu1 %1561  ;;  %2935 = vmatprep.mubr.msk.bf16.mxu0 %vm3212_vm3, %v3211_v37 }
 0x524   : > { %v1567_v62 = vsel %vm1211_vm2, %v1562_v60, 0 }
 0x525   : > { %2934 = vmatpush3.bf16.xpose.msra.mxu0 %v1567_v62 }
 0x526   : > { %2945 = vmatprep.subr.bf16.mxu0 %v3211_v37 }
 0x528   : > { %2942 = vmatmul.mubr.msk.bf16.vlgmr.msra.gmra.mrb[4].mxu1 %vm1211_vm2, %v1435_v0 }
 0x529   : > { %2953 = vmatprep.mubr.msk.bf16.mxu1 %vm3212_vm3, %v3211_v37 }
 0x52c   : > { %2936 = vmatmul.mubr.msk.bf16.vlgmr.msra.gmra.mrb[12].mxu0 %vm1211_vm2, %v1434_v36 }
 0x52d   : > { %2946 = vmatpush3.bf16.msra.mxu0 %v1456_v18  ;;  %2947 = vmatprep.mubr.msk.bf16.mxu0 %vm3212_vm3, %v3211_v37 }
 0x52e   : > { %2957 = vmatprep.subr.bf16.mxu0 %v3211_v37 }
 0x5f1   : > { %v1553_v63 = vpop.f32.mrb[0].mxu1 }
 0x5f2   : > { %v2931_v1 = vpop.f32.mrb[1].mxu1  ;;  %v1667_v2 = vsel %vm1660_vm4, %v1553_v63, -inf }
 0x5f3   : > { %1668 = vmax.xlane.f32.xlu0 %v1667_v2  ;;  %v1556_v3 = vpop.f32.mrb[2].mxu1 }
 0x5f4   : > { %v2932_v4 = vpop.f32.mrb[3].mxu1  ;;  %v1670_v5 = vsel %vm1660_vm4, %v1556_v3, -inf }
 0x5f5   : > { %1671 = vmax.xlane.f32.xlu1 %v1670_v5  ;;  %v1503_v6 = vpop.f32.mrb[8].mxu0 }
 0x5f6   : > { %v2925_v7 = vpop.f32.mrb[9].mxu0  ;;  %v1661_v28 = vsel %vm1660_vm4, %v1503_v6, -inf }
 0x5f7   : > { %v1506_v8 = vpop.f32.mrb[10].mxu0 }
 0x5f8   : > { %v2926_v9 = vpop.f32.mrb[11].mxu0  ;;  %v1664_v11 = vsel %vm1660_vm4, %v1506_v8, -inf }
 0x5f9   : > { %1665 = vmax.xlane.f32.xlu1 %v1664_v11 }
 0x5fb   : > { %v1653_v12 = vpop.f32.mrb[4].mxu1 }
 0x5fc   : > { %v2943_v14 = vpop.f32.mrb[5].mxu1  ;;  %v1679_v15 = vsel %vm1660_vm4, %v1653_v12, -inf }
 0x5fd   : > { %1680 = vmax.xlane.f32.xlu0 %v1679_v15  ;;  %v1656_v16 = vpop.f32.mrb[6].mxu1 }
 0x5fe   : > { %v2944_v18 = vpop.f32.mrb[7].mxu1  ;;  %v1682_v21 = vsel %vm1660_vm4, %v1656_v16, -inf }
 0x5ff   : > { %v1603_v19 = vpop.f32.mrb[12].mxu0 }
 0x600   : > { %v2937_v20 = vpop.f32.mrb[13].mxu0  ;;  %v1673_v31 = vsel %vm1660_vm4, %v1603_v19, -inf }
 0x601   : > { %1683 = vmax.xlane.f32.xlu0 %v1682_v21  ;;  %v1606_v22 = vpop.f32.mrb[14].mxu0 }
 0x602   : > { %v2938_v26 = vpop.f32.mrb[15].mxu0  ;;  %v1676_v27 = vsel %vm1660_vm4, %v1606_v22, -inf }
 0x603   : > { %1677 = vmax.xlane.f32.xlu1 %v1676_v27 }
 0x605   : > { %1662 = vmax.xlane.f32.xlu0 %v1661_v28 }
 0x609   : > { %1674 = vmax.xlane.f32.xlu0 %v1673_v31 }
 0x680   : > { %v1669_v32 = vpop.xlane.xlu0 %1668 }
 0x681   : > { %v1687_v33 = vsub.f32 %v1553_v63, %v1669_v32 }
 0x682   : > { %v1672_v36 = vpop.xlane.xlu1 %1671 }
 0x683   : > { %v1697_v38 = vmul.f32 1.442695, %v1687_v33  ;;  %v1688_v40 = vsub.f32 %v1556_v3, %v1672_v36 }
 0x685   : > { %3119 = vpow2.f32 %v1697_v38  ;;  %v1699_v41 = vmul.f32 1.442695, %v1688_v40 }
 0x686   : > { %v1666_v62 = vpop.xlane.xlu1 %1665 }
 0x687   : > { %3121 = vpow2.f32 %v1699_v41  ;;  %v1686_v0 = vsub.f32 %v1506_v8, %v1666_v62 }
 0x689   : > { %v1695_v2 = vmul.f32 1.442695, %v1686_v0 }
 0x68a   : > { %v1681_v45 = vpop.xlane.xlu0 %1680 }
 0x68b   : > { %v1691_v46 = vsub.f32 %v1653_v12, %v1681_v45 }
 0x68d   : > { %v1705_v49 = vmul.f32 1.442695, %v1691_v46 }
 0x68e   : > { %v1684_v50 = vpop.xlane.xlu0 %1683 }
 0x68f   : > { %v3120_v51 = vpop.eup %3119  ;;  %3123 = vpow2.f32 %v1705_v49  ;;  %v1692_v52 = vsub.f32 %v1656_v16, %v1684_v50 }
 0x690   : > { %v1715_v53 = vsel %vm1660_vm4, %v3120_v51, 0.0  ;;  %v1678_v4 = vpop.xlane.xlu1 %1677 }
 0x691   : > { %v3122_v54 = vpop.eup %3121  ;;  %v1707_v56 = vmul.f32 1.442695, %v1692_v52  ;;  %1716 = vadd.xlane.f32.xlu0 %v1715_v53  ;;  %v1690_v7 = vsub.f32 %v1606_v22, %v1678_v4  ;;  %v3099_v4 = vld [vmem:[%s3410_s7 + $0x10] sm:$0xff]  }
 0x692   : > { %v1718_v57 = vsel %vm1660_vm4, %v3122_v54, 0.0  ;;  %v1663_v61 = vpop.xlane.xlu0 %1662 }
 0x693   : > { %3125 = vpow2.f32 %v1707_v56  ;;  %1719 = vadd.xlane.f32.xlu1 %v1718_v57  ;;  %v1685_v1 = vsub.f32 %v1503_v6, %v1663_v61  ;;  %v1703_v11 = vmul.f32 1.442695, %v1690_v7 }
 0x694   : > { %3127 = vpow2.f32 %v1695_v2  ;;  %v3097_v2 = vld [vmem:[%s3410_s7] sm:$0xff]  }
 0x695   : > { %v1693_v5 = vmul.f32 1.442695, %v1685_v1 }
 0x696   : > { %v1675_v63 = vpop.xlane.xlu0 %1674 }
 0x697   : > { %v1689_v3 = vsub.f32 %v1603_v19, %v1675_v63  ;;  %3129 = vpow2.f32 %v1693_v5 }
 0x699   : > { %v3621_v58 = vpop.eup %3123  ;;  %v1701_v9 = vmul.f32 1.442695, %v1689_v3  ;;  %v3098_v3 = vld [vmem:[%s3410_s7 + $0x8] sm:$0xff]  }
 0x69a   : > { %v1727_v59 = vsel %vm1660_vm4, %v3621_v58, 0.0 }
 0x69b   : > { %1728 = vadd.xlane.f32.xlu0 %v1727_v59  ;;  %3131 = vpow2.f32 %v1701_v9 }
 0x69c   : > { %3133 = vpow2.f32 %v1703_v11 }
 0x69d   : > { %v3126_v55 = vpop.eup %3125 }
 0x69e   : > { %v1730_v60 = vsel %vm1660_vm4, %v3126_v55, 0.0 }
 0x69f   : > { %1731 = vadd.xlane.f32.xlu1 %v1730_v60 }
 0x6b0   : > { %3077 = vrot.lane.b32.xlu1 %v3076_v34, %s3210_s2  ;;  %v3128_v34 = vpop.eup %3127 }
 0x6b1   : > { %3072 = vrot.lane.b32.xlu0 %v3071_v17, %s3210_s2  ;;  %v3130_v12 = vpop.eup %3129  ;;  %v1712_v13 = vsel %vm1660_vm4, %v3128_v34, 0.0  ;;  %s3875_s2 = sld [smem:[#allocation23_spill]] (!%p2829_p11) }
 0x6b2   : > { %v3132_v10 = vpop.eup %3131  ;;  %v1709_v17 = vsel %vm1660_vm4, %v3130_v12, 0.0 }
 0x6b3   : > { %v1721_v6 = vsel %vm1660_vm4, %v3132_v10, 0.0  ;;  %v3134_v8 = vpop.eup %3133 }
 0x6b4   : > { %v1724_v14 = vsel %vm1660_vm4, %v3134_v8, 0.0 }
 0x6d0   : > { %1713 = vadd.xlane.f32.xlu0 %v1712_v13 }
 0x6d4   : > { %1710 = vadd.xlane.f32.xlu1 %v1709_v17  ;;  %1722 = vadd.xlane.f32.xlu0 %v1721_v6 }
 0x6d8   : > { %1725 = vadd.xlane.f32.xlu1 %v1724_v14 }
 0x71e   : > { %v1717_v15 = vpop.xlane.xlu0 %1716 }
 0x720   : > { %v1720_v16 = vpop.xlane.xlu1 %1719 }
 0x721   : > { %3135 = vrcp.f32 %v1720_v16 }
 0x722   : > { %3137 = vrcp.f32 %v1717_v15 }
 0x728   : > { %v1729_v18 = vpop.xlane.xlu0 %1728 }
 0x729   : > { %3139 = vrcp.f32 %v1729_v18 }
 0x72b   : > { %v3136_v19 = vpop.eup %3135 }
 0x72c   : > { %v1732_v20 = vpop.xlane.xlu1 %1731  ;;  %v3073_v21 = vpop.permute.xlu0 %3072  ;;  %v1744_v28 = vmul.f32 %v3136_v19, %v3122_v54 }
 0x72d   : > { %v3138_v22 = vpop.eup %3137  ;;  %3141 = vrcp.f32 %v1732_v20  ;;  %v3075_v26 = vunpack.i.h.bf16 %v3073_v21  ;;  %v3074_v27 = vunpack.i.l.bf16 %v3073_v21 }
 0x72e   : > { %v1743_v32 = vmul.f32 %v3138_v22, %v3120_v51 }
 0x72f   : > { %v1457_v31 = vpack.c.bf16 %v3075_v26, %v3074_v27 }
 0x730   : > { %v3078_v33 = vpop.permute.xlu1 %3077  ;;  %v1750_v40 = vpack.c.bf16 %v1744_v28, %v1743_v32 }
 0x731   : > { %v3080_v36 = vunpack.i.h.bf16 %v3078_v33  ;;  %v3079_v38 = vunpack.i.l.bf16 %v3078_v33  ;;  %2952 = vmatpush3.bf16.msra.mxu1 %v1457_v31 }
 0x732   : > { %2963 = vmatprep.subr.bf16.mxu1 %v3211_v37 }
 0x733   : > { %v1459_v41 = vpack.c.bf16 %v3080_v36, %v3079_v38  ;;  %v3140_v45 = vpop.eup %3139 }
 0x734   : > { %2954 = vmatmul.mubr.msk.bf16.vlgmr.msra.gmra.mrb[8].mxu1 %vm1660_vm4, %v1750_v40  ;;  %v1747_v49 = vmul.f32 %v3140_v45, %v3621_v58  ;;  %v2048_v40 = vsub.s32 2, %v3526_v24 }
 0x735   : > { %2964 = vmatpush3.bf16.msra.mxu1 %v1459_v41  ;;  %2965 = vmatprep.mubr.msk.bf16.mxu1 %vm3212_vm3, %v3211_v37  ;;  %v2806_v41 = vld [vmem:[%s3866_s22] ss:$0 sm:$0xff] }
 0x737   : > { %v3142_v46 = vpop.eup %3141 }
 0x738   : > { %v1748_v50 = vmul.f32 %v3142_v46, %v3126_v55  ;;  %v2049_v46 = vrot.slane %v3530_v25, %v2048_v40 }
 0x73a   : > { %v1752_v51 = vpack.c.bf16 %v1748_v50, %v1747_v49 }
 0x73c   : > { %2966 = vmatmul.mubr.msk.bf16.vlgmr.msra.gmra.mrb[12].mxu1 %vm1660_vm4, %v1752_v51  ;;  %v2053_v51 = vrot.slane %v3550_v39, %v2048_v40  ;;  %v2138_v40 = vsub.s32 3, %v3526_v24 }
 0x75d   : > { %v1714_v52 = vpop.xlane.xlu0 %1713 }
 0x75e   : > { %3143 = vrcp.f32 %v1714_v52 }
 0x761   : > { %v1711_v53 = vpop.xlane.xlu1 %1710  ;;  %v1723_v54 = vpop.xlane.xlu0 %1722 }
 0x762   : > { %3145 = vrcp.f32 %v1711_v53 }
 0x765   : > { %v1726_v56 = vpop.xlane.xlu1 %1725 }
 0x766   : > { %3147 = vrcp.f32 %v1726_v56 }
 0x767   : > { %3149 = vrcp.f32 %v1723_v54 }
 0x768   : > { %v3144_v57 = vpop.eup %3143 }
 0x769   : > { %v1742_v60 = vmul.f32 %v3144_v57, %v3128_v34 }
 0x76c   : > { %v3146_v59 = vpop.eup %3145 }
 0x76d   : > { %v1741_v61 = vmul.f32 %v3146_v59, %v3130_v12 }
 0x76f   : > { %v1749_v62 = vpack.c.bf16 %v1742_v60, %v1741_v61 }
 0x770   : > { %v3148_v58 = vpop.eup %3147 }
 0x771   : > { %2948 = vmatmul.mubr.msk.bf16.vlgmr.msra.gmra.mrb[16].mxu0 %vm1660_vm4, %v1749_v62  ;;  %v3150_v55 = vpop.eup %3149  ;;  %v1746_v0 = vmul.f32 %v3148_v58, %v3134_v8 }
 0x772   : > { %2958 = vmatpush3.bf16.msra.mxu0 %v1458_v35  ;;  %2959 = vmatprep.mubr.msk.bf16.mxu0 %vm3212_vm3, %v3211_v37  ;;  %v1745_v63 = vmul.f32 %v3150_v55, %v3132_v10 }
 0x773   : > { %2969 = vmatprep.subr.bf16.mxu0 %v3097_v2 }
 0x774   : > { %v1751_v1 = vpack.c.bf16 %v1746_v0, %v1745_v63 }
 0x779   : > { %2960 = vmatmul.mubr.msk.bf16.vlgmr.msra.gmra.mrb[20].mxu0 %vm1660_vm4, %v1751_v1 }
 0x77a   : > { %2970 = vmatpush3.bf16.msra.mxu0 %v3097_v2 }
 0x77b   : > { %2971 = vmatprep.subr.bf16.mxu0 %v3098_v3 }
 0x77e   : > { %2972 = vmatpush3.bf16.msra.mxu0 %v3098_v3 }
 0x77f   : > { %2973 = vmatprep.subr.bf16.mxu0 %v3099_v4 }
 0x782   : > { %2974 = vmatpush3.bf16.msra.mxu0 %v3099_v4 }
 0x783   : > { %2975 = vmatprep.subr.bf16.mxu0 %v3100_v30 }
 0x786   : > { %2976 = vmatpush3.bf16.msra.mxu0 %v3100_v30 }
 0x807   : > { %v1834_v23 = vpop.f32.mrb[8].mxu1 }
 0x808   : > { %v2955_v35 = vpop.f32.mrb[9].mxu1 }
 0x809   : > { %v1837_v5 = vpop.f32.mrb[10].mxu1 }
 0x80a   : > { %v3081_v37 = vpack.i.bf16 %v1837_v5, %v1834_v23  ;;  %v2956_v7 = vpop.f32.mrb[11].mxu1 }
 0x80c   : > { %3082 = vrot.lane.b32.xlu0 %v3081_v37, %s3214_s23 }
 0x80f   : > { %v1922_v9 = vpop.f32.mrb[12].mxu1 }
 0x810   : > { %v2967_v11 = vpop.f32.mrb[13].mxu1 }
 0x811   : > { %v1925_v34 = vpop.f32.mrb[14].mxu1 }
 0x812   : > { %v3086_v12 = vpack.i.bf16 %v1925_v34, %v1922_v9  ;;  %v2968_v13 = vpop.f32.mrb[15].mxu1 }
 0x814   : > { %3087 = vrot.lane.b32.xlu1 %v3086_v12, %s3214_s23  ;;  %s3871_s23 = sld [smem:[#allocation21_spill]] (!%p2829_p11) }
 0x844   : > { %v1790_v10 = vpop.f32.mrb[16].mxu0 }
 0x845   : > { %v2949_v17 = vpop.f32.mrb[17].mxu0 }
 0x846   : > { %v1793_v6 = vpop.f32.mrb[18].mxu0 }
 0x847   : > { %v2950_v8 = vpop.f32.mrb[19].mxu0 }
 0x84c   : > { %v1878_v14 = vpop.f32.mrb[20].mxu0 }
 0x84d   : > { %v2961_v15 = vpop.f32.mrb[21].mxu0 }
 0x84e   : > { %v1881_v16 = vpop.f32.mrb[22].mxu0  ;;  %v3101_v15 = vld [vmem:[%s3432_s0] sm:$0xff]  }
 0x84f   : > { %v2962_v18 = vpop.f32.mrb[23].mxu0  ;;  %2981 = vmatprep.subr.bf16.mxu1 %v3101_v15 }
 0x850   : > { %2982 = vmatpush3.bf16.msra.mxu1 %v3101_v15  ;;  %v3103_v18 = vld [vmem:[%s3438_s19] sm:$0xff]  }
 0x87e   : > { %v3083_v19 = vpop.permute.xlu0 %3082 }
 0x87f   : > { %v3085_v20 = vunpack.i.h.bf16 %v3083_v19  ;;  %v3084_v21 = vunpack.i.l.bf16 %v3083_v19 }
 0x881   : > { %v1946_v22 = vsel %vm1211_vm2, %v1793_v6, %v3085_v20  ;;  %v1945_v26 = vsel %vm1211_vm2, %v1790_v10, %v3084_v21 }
 0x882   : > { %v1949_v27 = vpack.c.bf16 %v1946_v22, %v1945_v26 }
 0x884   : > { %2977 = vmatprep.mubr.msk.bf16.mxu0 %vm1990_vm5, %v1949_v27 }
 0x886   : > { %v3088_v28 = vpop.permute.xlu1 %3087 }
 0x887   : > { %v3090_v31 = vunpack.i.h.bf16 %v3088_v28  ;;  %v3089_v32 = vunpack.i.l.bf16 %v3088_v28 }
 0x889   : > { %v1948_v33 = vsel %vm1211_vm2, %v1881_v16, %v3090_v31  ;;  %v1947_v36 = vsel %vm1211_vm2, %v1878_v14, %v3089_v32  ;;  %v3102_v16 = vld [vmem:[%s3432_s0 + $0x8] sm:$0xff]  }
 0x88a   : > { %v1950_v38 = vpack.c.bf16 %v1948_v33, %v1947_v36  ;;  %2983 = vmatprep.subr.bf16.mxu1 %v3102_v16 }
 0x88b   : > { %2984 = vmatpush3.bf16.msra.mxu1 %v3102_v16 }
 0x88c   : > { %2978 = vmatmul.mubr.msk.bf16.vlgmr.msra.gmra.mrb[24].mxu0 %vm1990_vm5, %v1950_v38  ;;  %2989 = vmatprep.subr.bf16.mxu1 %v3103_v18 }
 0x95f   : > { %v2979_v45 = vpop.f32.mrb[24].mxu0 }
 0x960   : > { %v2031_v49 = vpop.f32.mrb[25].mxu0  ;;  %v2040_v50 = vadd.f32 %v2979_v45, %v2806_v41  ;;  %v2813_v45 = vld [vmem:[%s3867_s1] ss:$0 sm:$0xff] }
 0x961   : > { %v2032_v52 = vadd.f32 %v2806_v41, %v2031_v49  ;;  %v2980_v53 = vpop.f32.mrb[26].mxu0 }
 0x962   : > { %v2043_v54 = vadd.f32 %v2980_v53, %v2806_v41  ;;  %v2034_v56 = vpop.f32.mrb[27].mxu0  ;;  %v2056_v61 = vmul.f32 %v2053_v51, %v2040_v50  ;;  %v2814_v50 = vld [vmem:[%s3868_s4] ss:$0 sm:$0xff]  ;;  %v2139_v53 = vrot.slane %v3538_v29, %v2138_v40 }
 0x963   : > { %v2054_v57 = vmul.f32 %v2049_v46, %v2032_v52  ;;  %v2035_v59 = vadd.f32 %v2806_v41, %v2034_v56 }
 0x964   : > { %v2057_v60 = vmul.f32 %v2053_v51, %v2043_v54  ;;  %v3679_v1 = vadd.f32 %v2056_v61, %v3500_v43  ;;  %v2150_v54 = vsub.s32 4, %v3526_v24 }
 0x965   : > { %v3668_v62 = vadd.f32 %v2054_v57, %v3498_v42  ;;  %v2055_v58 = vmul.f32 %v2049_v46, %v2035_v59 }
 0x966   : > { %v3671_v55 = vadd.f32 %v2057_v60, %v3508_v47  ;;  %v2070_v47 = vsel %vm1211_vm2, %v3679_v1, 0.0  ;;  %v2155_v29 = vrot.slane %v3550_v39, %v2150_v54 }
 0x967   : > { %v3674_v0 = vadd.f32 %v2055_v58, %v3502_v44  ;;  %v2064_v63 = vsel %vm1211_vm2, %v3668_v62, 0.0 }
 0x968   : > { %2065 = vadd.xlane.f32.xlu1 %v2064_v63  ;;  %v2073_v42 = vsel %vm1211_vm2, %v3671_v55, 0.0 }
 0x969   : > { %v2067_v2 = vsel %vm1211_vm2, %v3674_v0, 0.0 }
 0x96a   : > { %2068 = vadd.xlane.f32.xlu0 %v2067_v2  ;;  %v2151_v2 = vrot.slane %v3530_v25, %v2150_v54 }
 0x96c   : > { %2074 = vadd.xlane.f32.xlu1 %v2073_v42 }
 0x96e   : > { %2071 = vadd.xlane.f32.xlu0 %v2070_v47 }
 0x9f5   : > { %v2066_v44 = vpop.xlane.xlu1 %2065 }
 0x9f6   : > { %v2076_v3 = vmul.f32 0.03125, %v2066_v44  ;;  %v2143_v44 = vrot.slane %v3554_v48, %v2138_v40  ;;  %v2820_v40 = vld [vmem:[%s3870_s5] ss:$0 sm:$0xff] }
 0x9f7   : > { %v2069_v4 = vpop.xlane.xlu0 %2068 }
 0x9f8   : > { %v2080_v23 = vsub.f32 %v3668_v62, %v2076_v3  ;;  %v2077_v30 = vmul.f32 0.03125, %v2069_v4 }
 0x9f9   : > { %v2075_v43 = vpop.xlane.xlu1 %2074 }
 0x9fa   : > { %v2081_v35 = vsub.f32 %v3674_v0, %v2077_v30  ;;  %v2079_v5 = vmul.f32 0.03125, %v2075_v43  ;;  %v2084_v37 = vmul.f32 %v2080_v23, %v2080_v23 }
 0x9fb   : > { %v2072_v7 = vpop.xlane.xlu0 %2071 }
 0x9fc   : > { %v2083_v9 = vsub.f32 %v3671_v55, %v2079_v5  ;;  %v2078_v11 = vmul.f32 0.03125, %v2072_v7  ;;  %v2088_v34 = vsel %vm1211_vm2, %v2084_v37, 0.0  ;;  %v2085_v12 = vmul.f32 %v2081_v35, %v2081_v35 }
 0x9fd   : > { %2089 = vadd.xlane.f32.xlu0 %v2088_v34  ;;  %v3104_v34 = vld [vmem:[%s3438_s19 + $0x8] sm:$0xff]  }
 0x9fe   : > { %v2082_v13 = vsub.f32 %v3679_v1, %v2078_v11  ;;  %v2091_v10 = vsel %vm1211_vm2, %v2085_v12, 0.0  ;;  %v2087_v17 = vmul.f32 %v2083_v9, %v2083_v9  ;;  %v3105_v12 = vld [vmem:[%s3438_s19 + $0x10] sm:$0xff]  }
 0x9ff   : > { %2092 = vadd.xlane.f32.xlu1 %v2091_v10  ;;  %v3107_v10 = vld [vmem:[%s3438_s19 + $0x20] sm:$0xff]  }
 0xa00   : > { %v2086_v6 = vmul.f32 %v2082_v13, %v2082_v13  ;;  %v2097_v14 = vsel %vm1211_vm2, %v2087_v17, 0.0  ;;  %v3108_v17 = vld [vmem:[%s3438_s19 + $0x28] sm:$0xff]  }
 0xa02   : > { %v2094_v8 = vsel %vm1211_vm2, %v2086_v6, 0.0  ;;  %v3109_v6 = vld [vmem:[%s3438_s19 + $0x30] sm:$0xff]  }
 0xa03   : > { %2095 = vadd.xlane.f32.xlu0 %v2094_v8  ;;  %2098 = vadd.xlane.f32.xlu1 %v2097_v14  ;;  %v3110_v8 = vld [vmem:[%s3438_s19 + $0x38] sm:$0xff]   ;;  %v2815_v14 = vld [vmem:[%s3869_s26] ss:$0 sm:$0xff] }
 0xa8a   : > { %v2090_v19 = vpop.xlane.xlu0 %2089 }
 0xa8b   : > { %v2100_v20 = vmul.f32 0.03125, %v2090_v19 }
 0xa8c   : > { %v2093_v21 = vpop.xlane.xlu1 %2092 }
 0xa8d   : > { %v2104_v22 = vadd.f32 1e-05, %v2100_v20  ;;  %v2101_v26 = vmul.f32 0.03125, %v2093_v21 }
 0xa8f   : > { %3151 = vrsqrt.f32 %v2104_v22  ;;  %v2105_v27 = vadd.f32 1e-05, %v2101_v26 }
 0xa90   : > { %v2096_v28 = vpop.xlane.xlu0 %2095  ;;  %v2099_v31 = vpop.xlane.xlu1 %2098 }
 0xa91   : > { %3153 = vrsqrt.f32 %v2105_v27  ;;  %v2102_v32 = vmul.f32 0.03125, %v2096_v28  ;;  %v2103_v33 = vmul.f32 0.03125, %v2099_v31 }
 0xa93   : > { %v2106_v36 = vadd.f32 1e-05, %v2102_v32  ;;  %v2107_v38 = vadd.f32 1e-05, %v2103_v33 }
 0xa95   : > { %3155 = vrsqrt.f32 %v2106_v36 }
 0xa96   : > { %3157 = vrsqrt.f32 %v2107_v38  ;;  %v2368_v38 = vsub.s32 5, %v3526_v24 }
 0xa99   : > { %v3152_v41 = vpop.eup %3151 }
 0xa9a   : > { %v2112_v46 = vmul.f32 %v3152_v41, %v2080_v23  ;;  %v2373_v41 = vrot.slane %v3550_v39, %v2368_v38 }
 0xa9b   : > { %v3154_v49 = vpop.eup %3153 }
 0xa9c   : > { %v2122_v51 = vmul.f32 %v2813_v45, %v2112_v46  ;;  %v2113_v52 = vmul.f32 %v3154_v49, %v2081_v35  ;;  %v2369_v46 = vrot.slane %v3530_v25, %v2368_v38 }
 0xa9e   : > { %v2123_v56 = vmul.f32 %v2813_v45, %v2113_v52  ;;  %v2132_v57 = vadd.f32 %v2814_v50, %v2122_v51 }
 0xa9f   : > { %v3156_v59 = vpop.eup %3155 }
 0xaa0   : > { %v3158_v60 = vpop.eup %3157  ;;  %v2114_v61 = vmul.f32 %v3156_v59, %v2082_v13  ;;  %v2133_v58 = vadd.f32 %v2814_v50, %v2123_v56  ;;  %v2144_v63 = vmul.f32 %v2139_v53, %v2132_v57  ;;  %v3106_v13 = vld [vmem:[%s3438_s19 + $0x18] sm:$0xff]  }
 0xaa1   : > { %v2115_v42 = vmul.f32 %v3158_v60, %v2083_v9 }
 0xaa2   : > { %v2124_v47 = vmul.f32 %v2813_v45, %v2114_v61  ;;  %v2145_v3 = vmul.f32 %v2139_v53, %v2133_v58  ;;  %v2156_v30 = vadd.f32 %v2151_v2, %v2144_v63 }
 0xaa3   : > { %v2125_v4 = vmul.f32 %v2813_v45, %v2115_v42 }
 0xaa4   : > { %v2134_v23 = vadd.f32 %v2814_v50, %v2124_v47  ;;  %v2157_v43 = vadd.f32 %v2151_v2, %v2145_v3 }
 0xaa5   : > { %v2135_v35 = vadd.f32 %v2814_v50, %v2125_v4 }
 0xaa6   : > { %v2160_v5 = vpack.c.bf16 %v2157_v43, %v2156_v30  ;;  %v2146_v37 = vmul.f32 %v2143_v44, %v2134_v23 }
 0xaa7   : > { %v2147_v7 = vmul.f32 %v2143_v44, %v2135_v35 }
 0xaa8   : > { %2985 = vmatprep.mubr.msk.bf16.mxu1 %vm1211_vm2, %v2160_v5  ;;  %v2158_v9 = vadd.f32 %v2155_v29, %v2146_v37 }
 0xaa9   : > { %v2159_v11 = vadd.f32 %v2155_v29, %v2147_v7 }
 0xaab   : > { %v2161_v48 = vpack.c.bf16 %v2159_v11, %v2158_v9 }
 0xaad   : > { %2986 = vmatmul.mubr.msk.bf16.vlgmr.msra.gmra.mrb[16].mxu1 %vm1211_vm2, %v2161_v48 }
 0xaae   : > { %2990 = vmatpush3.bf16.msra.mxu1 %v3103_v18 }
 0xaaf   : > { %2991 = vmatprep.subr.bf16.mxu1 %v3104_v34 }
 0xab2   : > { %2992 = vmatpush3.bf16.msra.mxu1 %v3104_v34 }
 0xab3   : > { %2993 = vmatprep.subr.bf16.mxu1 %v3105_v12 }
 0xab6   : > { %2994 = vmatpush3.bf16.msra.mxu1 %v3105_v12 }
 0xab7   : > { %2995 = vmatprep.subr.bf16.mxu1 %v3106_v13 }
 0xaba   : > { %2996 = vmatpush3.bf16.msra.mxu1 %v3106_v13  ;;  %v3159_v13 = vld [vmem:[%s3871_s23] sm:$0xff] (!%p2829_p11)  }
 0xabb   : > { %2997 = vmatprep.subr.bf16.mxu1 %v3107_v10  ;;  %3009 = vmatprep.subr.bf16.mxu0 (!%p2829_p11), %v3159_v13 }
 0xabc   : > { %3010 = vmatpush3.bf16.msra.mxu0 (!%p2829_p11), %v3159_v13 }
 0xabe   : > { %2998 = vmatpush3.bf16.msra.mxu1 %v3107_v10  ;;  %v3160_v10 = vld [vmem:[%s3871_s23 + $0x8] sm:$0xff] (!%p2829_p11)  }
 0xabf   : > { %2999 = vmatprep.subr.bf16.mxu1 %v3108_v17  ;;  %3011 = vmatprep.subr.bf16.mxu0 (!%p2829_p11), %v3160_v10 }
 0xac0   : > { %3012 = vmatpush3.bf16.msra.mxu0 (!%p2829_p11), %v3160_v10 }
 0xac2   : > { %3000 = vmatpush3.bf16.msra.mxu1 %v3108_v17 }
 0xac3   : > { %3001 = vmatprep.subr.bf16.mxu1 %v3109_v6 }
 0xac6   : > { %3002 = vmatpush3.bf16.msra.mxu1 %v3109_v6 }
 0xac7   : > { %3003 = vmatprep.subr.bf16.mxu1 %v3110_v8 }
 0xaca   : > { %3004 = vmatpush3.bf16.msra.mxu1 %v3110_v8 }
 0xb80   : > { %v2987_v15 = vpop.f32.mrb[16].mxu1 }
 0xb81   : > { %v2234_v16 = vadd.f32 %v2987_v15, %v2815_v14  ;;  %v2225_v18 = vpop.f32.mrb[17].mxu1 }
 0xb82   : > { %v2226_v19 = vadd.f32 %v2815_v14, %v2225_v18  ;;  %v2988_v20 = vpop.f32.mrb[18].mxu1 }
 0xb83   : > { %v2237_v21 = vadd.f32 %v2988_v20, %v2815_v14  ;;  %v2228_v22 = vpop.f32.mrb[19].mxu1  ;;  %v2242_v27 = vmax.f32 %v2234_v16, 0.0 }
 0xb84   : > { %v2229_v26 = vadd.f32 %v2815_v14, %v2228_v22  ;;  %v2240_v31 = vmax.f32 %v2226_v19, 0.0 }
 0xb85   : > { %v2243_v28 = vmax.f32 %v2237_v21, 0.0 }
 0xb86   : > { %v2241_v32 = vmax.f32 %v2229_v26, 0.0 }
 0xb87   : > { %v2245_v33 = vpack.c.bf16 %v2243_v28, %v2242_v27 }
 0xb88   : > { %v2244_v36 = vpack.c.bf16 %v2241_v32, %v2240_v31  ;;  %v2830_v31 = vld [vmem:[%s3872_s25] ss:$0 sm:$0xff] (!%p2829_p11) }
 0xb8a   : > { %3005 = vmatprep.mubr.bf16.mxu1 %v2244_v36 }
 0xb8b   : > { %3006 = vmatmul.mubr.bf16.vlgmr.msra.gmra.mrb[20].mxu1 %v2245_v33 }
 0xc5e   : > { %v3007_v45 = vpop.f32.mrb[20].mxu1 }
 0xc5f   : > { %v2360_v49 = vadd.f32 %v3007_v45, %v2820_v40  ;;  %v2351_v50 = vpop.f32.mrb[21].mxu1 }
 0xc60   : > { %v2352_v51 = vadd.f32 %v2820_v40, %v2351_v50  ;;  %v3008_v52 = vpop.f32.mrb[22].mxu1 }
 0xc61   : > { %v2376_v53 = vmul.f32 %v2373_v41, %v2360_v49  ;;  %v2363_v54 = vadd.f32 %v3008_v52, %v2820_v40  ;;  %v2354_v56 = vpop.f32.mrb[23].mxu1 }
 0xc62   : > { %v2374_v57 = vmul.f32 %v2369_v46, %v2352_v51  ;;  %v2355_v59 = vadd.f32 %v2820_v40, %v2354_v56  ;;  %2389 = sbr.rel (%p2829_p11) target bundleno = 3715 (0xe83), region = 158  ;;  %v2831_v40 = vld [vmem:[%s3873_s28] ss:$0 sm:$0xff] (!%p2829_p11) }
 0xc63   : > { %v2380_v24 = vadd.f32 %v2376_v53, %v3679_v1  ;;  %v2377_v60 = vmul.f32 %v2373_v41, %v2363_v54 }
 0xc64   : > { %v2378_v61 = vadd.f32 %v2374_v57, %v3668_v62  ;;  %v2375_v58 = vmul.f32 %v2369_v46, %v2355_v59 }
 0xc65   : > { %2384 = vst.msk [vmem:[#allocation2 + $0x10] sm:$0xff] %vm1211_vm2, %v2380_v24  ;;  %v2381_v39 = vadd.f32 %v2377_v60, %v3671_v55  ;;  %v2398_v62 = vsel (!%p2829_p11), %vm1211_vm2, %v2380_v24, 0.0 }
 0xc66   : > { %2382 = vst.msk [vmem:[#allocation2] sm:$0xff] %vm1211_vm2, %v2378_v61  ;;  %v2379_v25 = vadd.f32 %v2375_v58, %v3674_v0  ;;  %v2392_v1 = vsel (!%p2829_p11), %vm1211_vm2, %v2378_v61, 0.0  ;;  %2399 = vadd.xlane.f32.xlu1 (!%p2829_p11), %v2398_v62 }
 0xc67   : > { %2385 = vst.msk [vmem:[#allocation2 + $0x18] sm:$0xff] %vm1211_vm2, %v2381_v39  ;;  %2393 = vadd.xlane.f32.xlu0 (!%p2829_p11), %v2392_v1  ;;  %v2401_v55 = vsel (!%p2829_p11), %vm1211_vm2, %v2381_v39, 0.0 }
 0xc68   : > { %2383 = vst.msk [vmem:[#allocation2 + $0x8] sm:$0xff] %vm1211_vm2, %v2379_v25  ;;  %v2395_v63 = vsel (!%p2829_p11), %vm1211_vm2, %v2379_v25, 0.0 }
 0xc6a   : > { %2402 = vadd.xlane.f32.xlu1 %v2401_v55 }
 0xc6b   : > { %2396 = vadd.xlane.f32.xlu0 %v2395_v63 }
 0xcf3   : > { %v2400_v2 = vpop.xlane.xlu1 %2399 }
 0xcf4   : > { %v2394_v0 = vpop.xlane.xlu0 %2393  ;;  %v2406_v47 = vmul.f32 0.03125, %v2400_v2 }
 0xcf5   : > { %v2404_v42 = vmul.f32 0.03125, %v2394_v0 }
 0xcf6   : > { %v2410_v3 = vsub.f32 %v2380_v24, %v2406_v47  ;;  %v2832_v24 = vld [vmem:[%s3874_s21] ss:$0 sm:$0xff] }
 0xcf7   : > { %v2408_v44 = vsub.f32 %v2378_v61, %v2404_v42  ;;  %v2403_v23 = vpop.xlane.xlu1 %2402 }
 0xcf8   : > { %v2397_v4 = vpop.xlane.xlu0 %2396  ;;  %v2407_v30 = vmul.f32 0.03125, %v2403_v23  ;;  %v2414_v35 = vmul.f32 %v2410_v3, %v2410_v3 }
 0xcf9   : > { %v2405_v29 = vmul.f32 0.03125, %v2397_v4  ;;  %v2412_v43 = vmul.f32 %v2408_v44, %v2408_v44 }
 0xcfa   : > { %v2411_v37 = vsub.f32 %v2381_v39, %v2407_v30  ;;  %v2422_v9 = vsel %vm1211_vm2, %v2414_v35, 0.0 }
 0xcfb   : > { %v2409_v5 = vsub.f32 %v2379_v25, %v2405_v29  ;;  %v2416_v7 = vsel %vm1211_vm2, %v2412_v43, 0.0 }
 0xcfc   : > { %2417 = vadd.xlane.f32.xlu0 %v2416_v7  ;;  %v2415_v48 = vmul.f32 %v2411_v37, %v2411_v37 }
 0xcfd   : > { %v2413_v11 = vmul.f32 %v2409_v5, %v2409_v5 }
 0xcfe   : > { %v2425_v12 = vsel %vm1211_vm2, %v2415_v48, 0.0 }
 0xcff   : > { %v2419_v34 = vsel %vm1211_vm2, %v2413_v11, 0.0 }
 0xd00   : > { %2423 = vadd.xlane.f32.xlu0 %v2422_v9  ;;  %2420 = vadd.xlane.f32.xlu1 %v2419_v34 }
 0xd04   : > { %2426 = vadd.xlane.f32.xlu1 %v2425_v12 }
 0xd89   : > { %v2418_v17 = vpop.xlane.xlu0 %2417 }
 0xd8a   : > { %v2428_v6 = vmul.f32 0.03125, %v2418_v17 }
 0xd8c   : > { %v2432_v8 = vadd.f32 1e-05, %v2428_v6 }
 0xd8d   : > { %v2421_v14 = vpop.xlane.xlu1 %2420  ;;  %v2424_v15 = vpop.xlane.xlu0 %2423 }
 0xd8e   : > { %3161 = vrsqrt.f32 %v2432_v8  ;;  %v2429_v16 = vmul.f32 0.03125, %v2421_v14  ;;  %v2430_v18 = vmul.f32 0.03125, %v2424_v15 }
 0xd90   : > { %v2433_v19 = vadd.f32 1e-05, %v2429_v16  ;;  %v2434_v20 = vadd.f32 1e-05, %v2430_v18 }
 0xd91   : > { %v2427_v21 = vpop.xlane.xlu1 %2426 }
 0xd92   : > { %3163 = vrsqrt.f32 %v2433_v19  ;;  %v2431_v22 = vmul.f32 0.03125, %v2427_v21 }
 0xd93   : > { %3165 = vrsqrt.f32 %v2434_v20 }
 0xd94   : > { %v2435_v26 = vadd.f32 1e-05, %v2431_v22 }
 0xd96   : > { %3167 = vrsqrt.f32 %v2435_v26 }
 0xd98   : > { %v3162_v27 = vpop.eup %3161 }
 0xd99   : > { %v2440_v28 = vmul.f32 %v3162_v27, %v2408_v44 }
 0xd9b   : > { %v2450_v38 = vmul.f32 %v2830_v31, %v2440_v28 }
 0xd9c   : > { %v3164_v32 = vpop.eup %3163 }
 0xd9d   : > { %v3166_v33 = vpop.eup %3165  ;;  %v2441_v36 = vmul.f32 %v3164_v32, %v2409_v5  ;;  %v2460_v49 = vadd.f32 %v2831_v40, %v2450_v38 }
 0xd9e   : > { %v2442_v41 = vmul.f32 %v3166_v33, %v2410_v3 }
 0xd9f   : > { %v2451_v45 = vmul.f32 %v2830_v31, %v2441_v36 }
 0xda0   : > { %v3168_v46 = vpop.eup %3167  ;;  %v2452_v52 = vmul.f32 %v2830_v31, %v2442_v41 }
 0xda1   : > { %v2461_v50 = vadd.f32 %v2831_v40, %v2451_v45  ;;  %v2443_v51 = vmul.f32 %v3168_v46, %v2411_v37 }
 0xda2   : > { %v2462_v56 = vadd.f32 %v2831_v40, %v2452_v52 }
 0xda3   : > { %v2464_v53 = vpack.c.bf16 %v2461_v50, %v2460_v49  ;;  %v2453_v54 = vmul.f32 %v2830_v31, %v2443_v51 }
 0xda5   : > { %3013 = vmatprep.mubr.msk.bf16.mxu0 %vm1211_vm2, %v2464_v53  ;;  %v2463_v57 = vadd.f32 %v2831_v40, %v2453_v54 }
 0xda7   : > { %v2465_v59 = vpack.c.bf16 %v2463_v57, %v2462_v56 }
 0xda9   : > { %3014 = vmatmul.mubr.msk.bf16.vlgmr.msra.gmra.mrb[0].mxu0 %vm1211_vm2, %v2465_v59 }
 0xe7c   : > { %v3015_v60 = vpop.f32.mrb[0].mxu0 }
 0xe7d   : > { %v2538_v61 = vadd.f32 %v3015_v60, %v2832_v24  ;;  %v2529_v58 = vpop.f32.mrb[1].mxu0 }
 0xe7e   : > { %v2530_v39 = vadd.f32 %v2832_v24, %v2529_v58  ;;  %v3016_v25 = vpop.f32.mrb[2].mxu0 }
 0xe7f   : > { %2546 = vst [vmem:[%s3875_s2 + $0x10] sm:$0xff] %v2538_v61  ;;  %v2541_v1 = vadd.f32 %v3016_v25, %v2832_v24  ;;  %v2532_v62 = vpop.f32.mrb[3].mxu0 }
 0xe80   : > { %2544 = vst [vmem:[%s3875_s2] sm:$0xff] %v2530_v39  ;;  %v2533_v63 = vadd.f32 %v2832_v24, %v2532_v62 }
 0xe81   : > { %2547 = vst [vmem:[%s3875_s2 + $0x18] sm:$0xff] %v2541_v1 }
 0xe82   : > { %2545 = vst [vmem:[%s3875_s2 + $0x8] sm:$0xff] %v2533_v63 }
 0xe83 PF: > { %s3876_s0 = sld [smem:[#allocation6_spill]]  ;;  %s3877_s4 = sld [smem:[#allocation4_spill]] }
 0xe84   : > { %s3878_s30 = sld [smem:[#allocation8_spill]]  ;;  %s3879_s24 = sld [smem:[#allocation5_spill]] }
 0xe85   : > { %s3880_s25 = sld [smem:[#allocation7_spill]] }
 0xe89   : > { %s33_s5 = sadd.s32 1, %s3876_s0  }
 0xe8a   : > { %p30_p12 = scmp.ge.s32.totalorder %s33_s5, 4  }
 0xe8c   :  { %32 = sbr.rel (!%p30_p12) target bundleno = 19 (0x13), region = 232 }

</bundles_post_ra>
